<compile_context>
chip_gen: v6e
topology: v6e:2x2x1
jax: 0.10.0
libtpu: 0.0.40
codegen_flags: <defaults>
</compile_context>

<pallas_src>
import functools

import jax
import jax.numpy as jnp
from jax import lax
from jax.experimental import pallas as pl
from jax.experimental.pallas import tpu as pltpu

_LANES = 128
_ROW_ALIGN = 16            # sublane alignment for packed bf16


def _round_up(x, m):
    return (x + m - 1) // m * m


def _vmem_limit_bytes():
    try:
        cap = pltpu.get_tpu_info().vmem_capacity_bytes
    except Exception:
        return 48 * 1024 * 1024
    if cap >= 100 * 1024 * 1024:
        return 96 * 1024 * 1024     # v5e / v6e: 128 MiB physical VMEM
    return 40 * 1024 * 1024         # v7x: 64 MiB physical VMEM


def _pick_tile_h(h, wpm, n_batch, target=2048):
    """tile_h | h, flat tile = tile_h*wpm (always a multiple of 16)."""
    divs = [d for d in range(1, h + 1) if h % d == 0]
    fits = [d for d in divs if d * wpm <= target] or [1]
    tile_h = max(fits)
    # v7x has 2 TensorCores: prefer an even number of grid steps when that
    # does not shrink the tile by more than 2x.
    if (n_batch * (h // tile_h)) % 2:
        for d in sorted(fits, reverse=True):
            if (n_batch * (h // d)) % 2 == 0 and 2 * d >= tile_h:
                tile_h = d
                break
    return tile_h, h // tile_h


# ----------------------------- Pallas kernel --------------------------------

def _double_conv_kernel(u_ref, w1_ref, b1_ref, w2_ref, b2_ref, o_ref, mid_ref,
                        *, tile_h, wpm, w_img):
    # u_ref  : (Hpad*wpm, 3*Cin)    bf16 dw-unfolded padded input (resident / batch)
    # w1_ref : (3, 3*Cin, Cmid_p)   bf16 conv1 weights (BN scale folded, dw-major K)
    # b1_ref : (1, Cmid_p)          f32  conv1 folded BN bias
    # w2_ref : (3, 3*Cmid_p, Coutp) bf16 conv2 weights (dw-major K)
    # b2_ref : (1, Coutp)           f32  conv2 folded BN bias
    # o_ref  : (tile_h*wpm, Coutp)  f32  output tile (flat rows x channels)
    # mid_ref: (lmid+8, Cmid_p)     bf16 scratch: conv1 activation for this tile
    cmid_p = w1_ref.shape[-1]
    mrows = tile_h + 2                       # tile rows + 1-row halo each side
    lmid = mrows * wpm
    tout = tile_h * wpm
    ti = pl.program_id(1)
    r0 = ti * (tile_h * wpm)

    # ---- conv1 + folded BN + ReLU: 3 aligned MXU dots, K = 3*Cin ----
    a = jnp.dot(u_ref[pl.ds(pl.multiple_of(r0, wpm), lmid), :], w1_ref[0],
                preferred_element_type=jnp.float32)
    a = a + jnp.dot(u_ref[pl.ds(pl.multiple_of(r0 + wpm, wpm), lmid), :],
                    w1_ref[1], preferred_element_type=jnp.float32)
    a = a + jnp.dot(u_ref[pl.ds(pl.multiple_of(r0 + 2 * wpm, wpm), lmid), :],
                    w1_ref[2], preferred_element_type=jnp.float32)

    # Zero the left / right zero-pad columns of the mid activation (the flat
    # row pitch wpm carries 1 left + (wpm - w_img - 1) right pad columns).
    col = lax.broadcasted_iota(jnp.int32, (lmid, 1), 0) % wpm
    keep = jnp.logical_and(col >= 1, col <= w_img)
    mid_ref[pl.ds(0, lmid), :] = jnp.where(
        keep, jnp.maximum(a + b1_ref[...], 0.0), 0.0).astype(mid_ref.dtype)
    # Scratch tail only ever feeds discarded output columns; keep it finite.
    mid_ref[pl.ds(lmid, 8), :] = jnp.zeros((8, cmid_p), mid_ref.dtype)

    @pl.when(ti == 0)
    def _():                                 # top zero-padding row of mid
        mid_ref[pl.ds(0, wpm), :] = jnp.zeros((wpm, cmid_p), mid_ref.dtype)

    @pl.when(ti == pl.num_programs(1) - 1)
    def _():                                 # bottom zero-padding row of mid
        mid_ref[pl.ds(lmid - wpm, wpm), :] = jnp.zeros((wpm, cmid_p),
                                                       mid_ref.dtype)

    # ---- conv2 + folded BN + ReLU: dw taps fused into channels, K = 3*Cmid_p ----
    mid_all = mid_ref[...]
    midw = jnp.concatenate(
        [mid_all[0:lmid, :], mid_all[1:1 + lmid, :], mid_all[2:2 + lmid, :]],
        axis=-1)                                            # (lmid, 3*Cmid_p)
    acc = jnp.dot(midw[0:tout, :], w2_ref[0],
                  preferred_element_type=jnp.float32)
    acc = acc + jnp.dot(midw[wpm:wpm + tout, :], w2_ref[1],
                        preferred_element_type=jnp.float32)
    acc = acc + jnp.dot(midw[2 * wpm:2 * wpm + tout, :], w2_ref[2],
                        preferred_element_type=jnp.float32)
    o_ref[...] = jnp.maximum(acc + b2_ref[...], 0.0).astype(o_ref.dtype)


# ------------------------------ wrappers -------------------------------------

def maxpool2x2(x_nhwc):
    """2x2 max pool, stride 2 (floor), NHWC. Fused maximum tree in plain JAX."""
    N, H, W, C = x_nhwc.shape
    H2, W2 = H // 2, W // 2
    x = x_nhwc[:, :2 * H2, :2 * W2, :]                # PyTorch floor behavior
    a = jnp.maximum(x[:, 0::2, 0::2, :], x[:, 0::2, 1::2, :])
    b = jnp.maximum(x[:, 1::2, 0::2, :], x[:, 1::2, 1::2, :])
    return jnp.maximum(a, b)


def double_conv(x_nhwc, w1, gamma1, beta1, mean1, var1,
                w2, gamma2, beta2, mean2, var2, *, eps=1e-5,
                compute_dtype=jnp.bfloat16):
    """Fused [Conv3x3(pad=1) + BN(inference) + ReLU] x 2, channels-last."""
    N, H, W, Cin = x_nhwc.shape
    Cmid = w1.shape[-1]
    Cout = w2.shape[-1]
    Cmid_p = _round_up(Cmid, _LANES)
    Coutp = _round_up(Cout, _LANES)
    Wpm = _round_up(W + 2, _ROW_ALIGN)      # aligned flat row pitch
    Hpad = H + 4                            # 2 pad rows top & bottom (halo reads)

    # Fold inference BN into the conv weights and a bias.
    s1 = (gamma1 / jnp.sqrt(var1 + eps)).astype(jnp.float32)
    bias1 = (beta1 - mean1 * s1).astype(jnp.float32)
    s2 = (gamma2 / jnp.sqrt(var2 + eps)).astype(jnp.float32)
    bias2 = (beta2 - mean2 * s2).astype(jnp.float32)

    w1f = (w1.astype(jnp.float32) * s1).reshape(3, 3 * Cin, Cmid)
    w1f = jnp.pad(w1f, ((0, 0), (0, 0), (0, Cmid_p - Cmid))).astype(compute_dtype)
    b1p = jnp.pad(bias1, (0, Cmid_p - Cmid)).reshape(1, Cmid_p)

    w2f = w2.astype(jnp.float32) * s2
    w2f = jnp.pad(w2f, ((0, 0), (0, 0), (0, Cmid_p - Cmid), (0, Coutp - Cout)))
    w2f = w2f.reshape(3, 3 * Cmid_p, Coutp).astype(compute_dtype)
    b2p = jnp.pad(bias2, (0, Coutp - Cout)).reshape(1, Coutp)

    # dw-unfolded, zero-padded input slab:
    #   u[n, r*Wpm + j, dw*Cin:(dw+1)*Cin] = x[n, r - 2, j - 2 + dw, :]
    # (zeros outside the image).  bf16 halves the wrapper + DMA traffic.
    x_c = x_nhwc.astype(compute_dtype)
    xp = jnp.pad(x_c, ((0, 0), (2, 2), (2, Wpm - W), (0, 0)))
    u = jnp.concatenate([xp[:, :, dw:dw + Wpm, :] for dw in range(3)], axis=-1)
    u = u.reshape(N, Hpad * Wpm, 3 * Cin)

    tile_h, n_tiles = _pick_tile_h(H, Wpm, N)
    lmid = (tile_h + 2) * Wpm
    tout = tile_h * Wpm
    kernel = functools.partial(_double_conv_kernel,
                               tile_h=tile_h, wpm=Wpm, w_img=W)

    flops = 2 * N * n_tiles * 3 * (lmid * 3 * Cin * Cmid_p
                                   + tout * 3 * Cmid_p * Coutp)
    bytes_accessed = (u.size * 2 + w1f.size * 2 + w2f.size * 2
                      + N * H * Wpm * Coutp * 4)

    out_flat = pl.pallas_call(
        kernel,
        out_shape=jax.ShapeDtypeStruct((N, H * Wpm, Coutp), jnp.float32),
        grid=(N, n_tiles),
        in_specs=[
            # Full dw-unfolded slab, resident across the spatial tiles of a batch.
            pl.BlockSpec((None, Hpad * Wpm, 3 * Cin), lambda b, t: (b, 0, 0)),
            pl.BlockSpec((3, 3 * Cin, Cmid_p), lambda b, t: (0, 0, 0)),
            pl.BlockSpec((1, Cmid_p), lambda b, t: (0, 0)),
            pl.BlockSpec((3, 3 * Cmid_p, Coutp), lambda b, t: (0, 0, 0)),
            pl.BlockSpec((1, Coutp), lambda b, t: (0, 0)),
        ],
        out_specs=pl.BlockSpec((None, tout, Coutp), lambda b, t: (b, t, 0)),
        scratch_shapes=[pltpu.VMEM((lmid + 8, Cmid_p), compute_dtype)],
        compiler_params=pltpu.CompilerParams(
            dimension_semantics=("parallel", "parallel"),
            vmem_limit_bytes=_vmem_limit_bytes()),
        cost_estimate=pl.CostEstimate(flops=int(flops), transcendentals=0,
                                      bytes_accessed=int(bytes_accessed)),
    )(u, w1f, b1p, w2f, b2p)

    # Drop the row-pitch padding columns and the lane padding (fuses with the
    # final NHWC->NCHW transpose in XLA).
    return out_flat.reshape(N, H, Wpm, Coutp)[:, :, :W, :Cout]


def init_down_params(key, in_channels, out_channels):
    mid_channels = out_channels            # DoubleConv default: mid = out
    k1, k2 = jax.random.split(key)
    return {
        "conv1_w": 0.1 * jax.random.normal(
            k1, (3, 3, in_channels, mid_channels), jnp.float32),
        "bn1_gamma": jnp.ones((mid_channels,), jnp.float32),
        "bn1_beta": jnp.zeros((mid_channels,), jnp.float32),
        "bn1_mean": jnp.zeros((mid_channels,), jnp.float32),
        "bn1_var": jnp.ones((mid_channels,), jnp.float32),
        "conv2_w": 0.1 * jax.random.normal(
            k2, (3, 3, mid_channels, out_channels), jnp.float32),
        "bn2_gamma": jnp.ones((out_channels,), jnp.float32),
        "bn2_beta": jnp.zeros((out_channels,), jnp.float32),
        "bn2_mean": jnp.zeros((out_channels,), jnp.float32),
        "bn2_var": jnp.ones((out_channels,), jnp.float32),
    }


@jax.jit
def down_forward(x_nchw, params):
    """Full `Down.forward`: NCHW in, NCHW out (matches PyTorch)."""
    x = jnp.transpose(x_nchw.astype(jnp.bfloat16), (0, 2, 3, 1))  # NHWC bf16
    x = maxpool2x2(x)
    x = double_conv(
        x,
        params["conv1_w"], params["bn1_gamma"], params["bn1_beta"],
        params["bn1_mean"], params["bn1_var"],
        params["conv2_w"], params["bn2_gamma"], params["bn2_beta"],
        params["bn2_mean"], params["bn2_var"])
    return jnp.transpose(x, (0, 3, 1, 2))                          # NCHW f32


# --------------------------- pure-JAX reference ------------------------------

def _conv_bn_relu_ref(x, w, gamma, beta, mean, var, eps=1e-5,
                      compute_dtype=jnp.bfloat16):
    scale = gamma / jnp.sqrt(var + eps)
    bias = beta - mean * scale
    w_sc = (w * scale).astype(compute_dtype).astype(jnp.float32)
    x_c = x.astype(compute_dtype).astype(jnp.float32)
    y = lax.conv_general_dilated(
        x_c, w_sc, window_strides=(1, 1), padding="SAME",
        dimension_numbers=("NHWC", "HWIO", "NHWC"))
    return jnp.maximum(y + bias, 0.0)


def down_ref(x_nchw, params):
    x = jnp.transpose(x_nchw, (0, 2, 3, 1))
    x = maxpool2x2(x)
    x = _conv_bn_relu_ref(x, params["conv1_w"], params["bn1_gamma"],
                          params["bn1_beta"], params["bn1_mean"],
                          params["bn1_var"])
    x = _conv_bn_relu_ref(x, params["conv2_w"], params["bn2_gamma"],
                          params["bn2_beta"], params["bn2_mean"],
                          params["bn2_var"])
    return jnp.transpose(x, (0, 3, 1, 2))


if __name__ == "__main__":
    key = jax.random.PRNGKey(0)
    kx, kp = jax.random.split(key)

    N, C_in, H, W = 2, 4, 16, 16
    C_out = 8

    x = jax.random.normal(kx, (N, C_in, H, W), jnp.float32)   # NCHW, like PyTorch
    params = init_down_params(kp, C_in, C_out)

    y = down_forward(x, params)
    jax.block_until_ready(y)
    assert y.shape == (N, C_out, H // 2, W // 2), y.shape

    y_ref = down_ref(x, params)
    max_diff = float(jnp.max(jnp.abs(y - y_ref)))
    assert jnp.allclose(y, y_ref, rtol=1e-2, atol=1e-2), (
        "max abs diff vs reference: " + str(max_diff))

    print("KERNEL_OK")
</pallas_src>

<mosaic_0001>
module attributes {stable_mosaic.version = 11 : i64} {
  func.func @_double_conv_kernel(%arg0: i32, %arg1: i32, %arg2: memref<1x192x12xbf16, #tpu.memory_space<vmem>>, %arg3: memref<3x12x128xbf16, #tpu.memory_space<vmem>>, %arg4: memref<1x128xf32, #tpu.memory_space<vmem>>, %arg5: memref<3x384x128xbf16, #tpu.memory_space<vmem>>, %arg6: memref<1x128xf32, #tpu.memory_space<vmem>>, %arg7: memref<1x128x128xf32, #tpu.memory_space<vmem>>, %arg8: memref<168x128xbf16, #tpu.memory_space<vmem>>) attributes {dimension_semantics = [#tpu.dimension_semantics<parallel>, #tpu.dimension_semantics<parallel>], iteration_bounds = array<i64: 2, 1>, scalar_prefetch = 0 : i64, scratch_operands = 1 : i64, tpu.core_type = #tpu.core_type<tc>, window_params = [{transform_indices = @transform_0, window_bounds = array<i64: 1, 192, 12>}, {pipeline_mode = #tpu.pipeline_mode<synchronous>, transform_indices = @transform_1, window_bounds = array<i64: 3, 12, 128>}, {pipeline_mode = #tpu.pipeline_mode<synchronous>, transform_indices = @transform_2, window_bounds = array<i64: 1, 128>}, {pipeline_mode = #tpu.pipeline_mode<synchronous>, transform_indices = @transform_3, window_bounds = array<i64: 3, 384, 128>}, {pipeline_mode = #tpu.pipeline_mode<synchronous>, transform_indices = @transform_4, window_bounds = array<i64: 1, 128>}, {transform_indices = @transform_5, window_bounds = array<i64: 1, 128, 128>}]} {
    %c128_i32 = arith.constant 128 : i32
    %0 = arith.muli %arg1, %c128_i32 : i32
    %1 = tpu.assume_multiple %0, 16 : i32
    %c0 = arith.constant 0 : index
    %2 = arith.index_cast %1 : i32 to index
    %c0_0 = arith.constant 0 : index
    %3 = vector.load %arg2[%c0, %2, %c0_0] : memref<1x192x12xbf16, #tpu.memory_space<vmem>>, vector<1x160x12xbf16>
    %4 = vector.shape_cast %3 : vector<1x160x12xbf16> to vector<160x12xbf16>
    %c0_1 = arith.constant 0 : index
    %c0_2 = arith.constant 0 : index
    %c0_3 = arith.constant 0 : index
    %5 = vector.load %arg3[%c0_1, %c0_2, %c0_3] : memref<3x12x128xbf16, #tpu.memory_space<vmem>>, vector<1x12x128xbf16>
    %6 = vector.shape_cast %5 : vector<1x12x128xbf16> to vector<12x128xbf16>
    %cst = arith.constant dense<0.000000e+00> : vector<160x128xf32>
    %7 = tpu.matmul %4, %6, %cst {dimension_numbers = #tpu.dot_dimension_numbers<[1], [0], [0], [1], [0, 0, 1, 1], [], []>} : vector<160x12xbf16>, vector<12x128xbf16>, vector<160x128xf32> -> vector<160x128xf32>
    %c16_i32 = arith.constant 16 : i32
    %8 = arith.addi %0, %c16_i32 : i32
    %9 = tpu.assume_multiple %8, 16 : i32
    %c0_4 = arith.constant 0 : index
    %10 = arith.index_cast %9 : i32 to index
    %c0_5 = arith.constant 0 : index
    %11 = vector.load %arg2[%c0_4, %10, %c0_5] : memref<1x192x12xbf16, #tpu.memory_space<vmem>>, vector<1x160x12xbf16>
    %12 = vector.shape_cast %11 : vector<1x160x12xbf16> to vector<160x12xbf16>
    %c1 = arith.constant 1 : index
    %c0_6 = arith.constant 0 : index
    %c0_7 = arith.constant 0 : index
    %13 = vector.load %arg3[%c1, %c0_6, %c0_7] : memref<3x12x128xbf16, #tpu.memory_space<vmem>>, vector<1x12x128xbf16>
    %14 = vector.shape_cast %13 : vector<1x12x128xbf16> to vector<12x128xbf16>
    %cst_8 = arith.constant dense<0.000000e+00> : vector<160x128xf32>
    %15 = tpu.matmul %12, %14, %cst_8 {dimension_numbers = #tpu.dot_dimension_numbers<[1], [0], [0], [1], [0, 0, 1, 1], [], []>} : vector<160x12xbf16>, vector<12x128xbf16>, vector<160x128xf32> -> vector<160x128xf32>
    %16 = arith.addf %7, %15 : vector<160x128xf32>
    %c32_i32 = arith.constant 32 : i32
    %17 = arith.addi %0, %c32_i32 : i32
    %18 = tpu.assume_multiple %17, 16 : i32
    %c0_9 = arith.constant 0 : index
    %19 = arith.index_cast %18 : i32 to index
    %c0_10 = arith.constant 0 : index
    %20 = vector.load %arg2[%c0_9, %19, %c0_10] : memref<1x192x12xbf16, #tpu.memory_space<vmem>>, vector<1x160x12xbf16>
    %21 = vector.shape_cast %20 : vector<1x160x12xbf16> to vector<160x12xbf16>
    %c2 = arith.constant 2 : index
    %c0_11 = arith.constant 0 : index
    %c0_12 = arith.constant 0 : index
    %22 = vector.load %arg3[%c2, %c0_11, %c0_12] : memref<3x12x128xbf16, #tpu.memory_space<vmem>>, vector<1x12x128xbf16>
    %23 = vector.shape_cast %22 : vector<1x12x128xbf16> to vector<12x128xbf16>
    %cst_13 = arith.constant dense<0.000000e+00> : vector<160x128xf32>
    %24 = tpu.matmul %21, %23, %cst_13 {dimension_numbers = #tpu.dot_dimension_numbers<[1], [0], [0], [1], [0, 0, 1, 1], [], []>} : vector<160x12xbf16>, vector<12x128xbf16>, vector<160x128xf32> -> vector<160x128xf32>
    %25 = arith.addf %16, %24 : vector<160x128xf32>
    %26 = tpu.iota {dimensions = array<i32: 0>} : vector<160x1xi32>
    %c16_i32_14 = arith.constant 16 : i32
    %c0_i32 = arith.constant 0 : i32
    %27 = arith.cmpi eq, %c16_i32_14, %c0_i32 : i32
    %c1_i32 = arith.constant 1 : i32
    %28 = arith.select %27, %c1_i32, %c16_i32_14 : i32
    %29 = vector.broadcast %28 : i32 to vector<160x1xi32>
    %30 = arith.remsi %26, %29 : vector<160x1xi32>
    %c0_i32_15 = arith.constant 0 : i32
    %31 = vector.broadcast %c0_i32_15 : i32 to vector<160x1xi32>
    %32 = arith.cmpi ne, %30, %31 : vector<160x1xi32>
    %c0_i32_16 = arith.constant 0 : i32
    %33 = vector.broadcast %c0_i32_16 : i32 to vector<160x1xi32>
    %34 = arith.cmpi slt, %30, %33 : vector<160x1xi32>
    %c0_i32_17 = arith.constant 0 : i32
    %35 = arith.cmpi slt, %28, %c0_i32_17 : i32
    %36 = vector.broadcast %35 : i1 to vector<160x1xi1>
    %37 = vector.broadcast %36 : vector<160x1xi1> to vector<160x1xi1>
    %38 = arith.xori %34, %37 : vector<160x1xi1>
    %39 = arith.andi %38, %32 : vector<160x1xi1>
    %40 = vector.broadcast %28 : i32 to vector<160x1xi32>
    %41 = arith.addi %30, %40 : vector<160x1xi32>
    %42 = arith.select %39, %41, %30 : vector<160x1xi1>, vector<160x1xi32>
    %c1_i32_18 = arith.constant 1 : i32
    %43 = vector.broadcast %c1_i32_18 : i32 to vector<160x1xi32>
    %44 = arith.cmpi sge, %42, %43 : vector<160x1xi32>
    %c8_i32 = arith.constant 8 : i32
    %45 = vector.broadcast %c8_i32 : i32 to vector<160x1xi32>
    %46 = arith.cmpi sle, %42, %45 : vector<160x1xi32>
    %47 = arith.andi %44, %46 : vector<160x1xi1>
    %c0_19 = arith.constant 0 : index
    %c0_20 = arith.constant 0 : index
    %48 = vector.load %arg4[%c0_19, %c0_20] : memref<1x128xf32, #tpu.memory_space<vmem>>, vector<1x128xf32>
    %49 = vector.broadcast %48 : vector<1x128xf32> to vector<160x128xf32>
    %50 = arith.addf %25, %49 : vector<160x128xf32>
    %cst_21 = arith.constant 0.000000e+00 : f32
    %51 = vector.broadcast %cst_21 : f32 to vector<160x128xf32>
    %52 = arith.maximumf %50, %51 : vector<160x128xf32>
    %cst_22 = arith.constant 0.000000e+00 : f32
    %53 = vector.shape_cast %47 : vector<160x1xi1> to vector<160x1xi1>
    %54 = vector.broadcast %53 : vector<160x1xi1> to vector<160x128xi1>
    %55 = vector.broadcast %cst_22 : f32 to vector<160x128xf32>
    %56 = arith.select %54, %52, %55 : vector<160x128xi1>, vector<160x128xf32>
    %57 = arith.truncf %56 : vector<160x128xf32> to vector<160x128xbf16>
    %c0_23 = arith.constant 0 : index
    %c0_24 = arith.constant 0 : index
    %58 = vector.load %arg8[%c0_23, %c0_24] : memref<168x128xbf16, #tpu.memory_space<vmem>>, vector<160x128xbf16>
    tpu.vector_store %arg8[%c0_23, %c0_24], %57 {strides = array<i32>} : memref<168x128xbf16, #tpu.memory_space<vmem>>, vector<160x128xbf16>,
    %cst_25 = arith.constant 0.000000e+00 : bf16
    %59 = vector.broadcast %cst_25 : bf16 to vector<8x128xbf16>
    %c160 = arith.constant 160 : index
    %c0_26 = arith.constant 0 : index
    %60 = vector.load %arg8[%c160, %c0_26] : memref<168x128xbf16, #tpu.memory_space<vmem>>, vector<8x128xbf16>
    tpu.vector_store %arg8[%c160, %c0_26], %59 {strides = array<i32>} : memref<168x128xbf16, #tpu.memory_space<vmem>>, vector<8x128xbf16>,
    %c0_i32_27 = arith.constant 0 : i32
    %61 = arith.cmpi eq, %arg1, %c0_i32_27 : i32
    %62 = arith.extui %61 : i1 to i32
    %c0_i32_28 = arith.constant 0 : i32
    %63 = arith.cmpi ne, %62, %c0_i32_28 : i32
    scf.if %63 {
      %cst_51 = arith.constant 0.000000e+00 : bf16
      %94 = vector.broadcast %cst_51 : bf16 to vector<16x128xbf16>
      %c0_52 = arith.constant 0 : index
      %c0_53 = arith.constant 0 : index
      %95 = vector.load %arg8[%c0_52, %c0_53] : memref<168x128xbf16, #tpu.memory_space<vmem>>, vector<16x128xbf16>
      tpu.vector_store %arg8[%c0_52, %c0_53], %94 {strides = array<i32>} : memref<168x128xbf16, #tpu.memory_space<vmem>>, vector<16x128xbf16>,
    } else {
    }
    %c0_i32_29 = arith.constant 0 : i32
    %64 = arith.cmpi eq, %arg1, %c0_i32_29 : i32
    %65 = arith.extui %64 : i1 to i32
    %c0_i32_30 = arith.constant 0 : i32
    %66 = arith.cmpi ne, %65, %c0_i32_30 : i32
    scf.if %66 {
      %cst_51 = arith.constant 0.000000e+00 : bf16
      %94 = vector.broadcast %cst_51 : bf16 to vector<16x128xbf16>
      %c144 = arith.constant 144 : index
      %c0_52 = arith.constant 0 : index
      %95 = vector.load %arg8[%c144, %c0_52] : memref<168x128xbf16, #tpu.memory_space<vmem>>, vector<16x128xbf16>
      tpu.vector_store %arg8[%c144, %c0_52], %94 {strides = array<i32>} : memref<168x128xbf16, #tpu.memory_space<vmem>>, vector<16x128xbf16>,
    } else {
    }
    %c0_31 = arith.constant 0 : index
    %c0_32 = arith.constant 0 : index
    %67 = vector.load %arg8[%c0_31, %c0_32] : memref<168x128xbf16, #tpu.memory_space<vmem>>, vector<168x128xbf16>
    %68 = vector.extract_strided_slice %67 {offsets = [0, 0], sizes = [160, 128], strides = [1, 1]} : vector<168x128xbf16> to vector<160x128xbf16>
    %69 = vector.extract_strided_slice %67 {offsets = [1, 0], sizes = [160, 128], strides = [1, 1]} : vector<168x128xbf16> to vector<160x128xbf16>
    %70 = vector.extract_strided_slice %67 {offsets = [2, 0], sizes = [160, 128], strides = [1, 1]} : vector<168x128xbf16> to vector<160x128xbf16>
    %71 = tpu.concatenate %68, %69, %70 in 1 : vector<160x128xbf16>, vector<160x128xbf16>, vector<160x128xbf16> -> vector<160x384xbf16>
    %72 = vector.extract_strided_slice %71 {offsets = [0, 0], sizes = [128, 384], strides = [1, 1]} : vector<160x384xbf16> to vector<128x384xbf16>
    %c0_33 = arith.constant 0 : index
    %c0_34 = arith.constant 0 : index
    %c0_35 = arith.constant 0 : index
    %73 = vector.load %arg5[%c0_33, %c0_34, %c0_35] : memref<3x384x128xbf16, #tpu.memory_space<vmem>>, vector<1x384x128xbf16>
    %74 = vector.shape_cast %73 : vector<1x384x128xbf16> to vector<384x128xbf16>
    %cst_36 = arith.constant dense<0.000000e+00> : vector<128x128xf32>
    %75 = tpu.matmul %72, %74, %cst_36 {dimension_numbers = #tpu.dot_dimension_numbers<[1], [0], [0], [1], [0, 0, 1, 1], [], []>} : vector<128x384xbf16>, vector<384x128xbf16>, vector<128x128xf32> -> vector<128x128xf32>
    %76 = vector.extract_strided_slice %71 {offsets = [16, 0], sizes = [128, 384], strides = [1, 1]} : vector<160x384xbf16> to vector<128x384xbf16>
    %c1_37 = arith.constant 1 : index
    %c0_38 = arith.constant 0 : index
    %c0_39 = arith.constant 0 : index
    %77 = vector.load %arg5[%c1_37, %c0_38, %c0_39] : memref<3x384x128xbf16, #tpu.memory_space<vmem>>, vector<1x384x128xbf16>
    %78 = vector.shape_cast %77 : vector<1x384x128xbf16> to vector<384x128xbf16>
    %cst_40 = arith.constant dense<0.000000e+00> : vector<128x128xf32>
    %79 = tpu.matmul %76, %78, %cst_40 {dimension_numbers = #tpu.dot_dimension_numbers<[1], [0], [0], [1], [0, 0, 1, 1], [], []>} : vector<128x384xbf16>, vector<384x128xbf16>, vector<128x128xf32> -> vector<128x128xf32>
    %80 = arith.addf %75, %79 : vector<128x128xf32>
    %81 = vector.extract_strided_slice %71 {offsets = [32, 0], sizes = [128, 384], strides = [1, 1]} : vector<160x384xbf16> to vector<128x384xbf16>
    %c2_41 = arith.constant 2 : index
    %c0_42 = arith.constant 0 : index
    %c0_43 = arith.constant 0 : index
    %82 = vector.load %arg5[%c2_41, %c0_42, %c0_43] : memref<3x384x128xbf16, #tpu.memory_space<vmem>>, vector<1x384x128xbf16>
    %83 = vector.shape_cast %82 : vector<1x384x128xbf16> to vector<384x128xbf16>
    %cst_44 = arith.constant dense<0.000000e+00> : vector<128x128xf32>
    %84 = tpu.matmul %81, %83, %cst_44 {dimension_numbers = #tpu.dot_dimension_numbers<[1], [0], [0], [1], [0, 0, 1, 1], [], []>} : vector<128x384xbf16>, vector<384x128xbf16>, vector<128x128xf32> -> vector<128x128xf32>
    %85 = arith.addf %80, %84 : vector<128x128xf32>
    %c0_45 = arith.constant 0 : index
    %c0_46 = arith.constant 0 : index
    %86 = vector.load %arg6[%c0_45, %c0_46] : memref<1x128xf32, #tpu.memory_space<vmem>>, vector<1x128xf32>
    %87 = vector.broadcast %86 : vector<1x128xf32> to vector<128x128xf32>
    %88 = arith.addf %85, %87 : vector<128x128xf32>
    %cst_47 = arith.constant 0.000000e+00 : f32
    %89 = vector.broadcast %cst_47 : f32 to vector<128x128xf32>
    %90 = arith.maximumf %88, %89 : vector<128x128xf32>
    %c0_48 = arith.constant 0 : index
    %c0_49 = arith.constant 0 : index
    %c0_50 = arith.constant 0 : index
    %91 = vector.load %arg7[%c0_48, %c0_49, %c0_50] : memref<1x128x128xf32, #tpu.memory_space<vmem>>, vector<1x128x128xf32>
    %92 = vector.shape_cast %91 : vector<1x128x128xf32> to vector<128x128xf32>
    %93 = vector.shape_cast %90 : vector<128x128xf32> to vector<1x128x128xf32>
    tpu.vector_store %arg7[%c0_48, %c0_49, %c0_50], %93 {strides = array<i32>} : memref<1x128x128xf32, #tpu.memory_space<vmem>>, vector<1x128x128xf32>,
    return
  }
  func.func @transform_0(%arg0: i32, %arg1: i32) -> (i32, i32, i32) {
    %c0_i32 = arith.constant 0 : i32
    %c0_i32_0 = arith.constant 0 : i32
    %c0_i32_1 = arith.constant 0 : i32
    return %arg0, %c0_i32, %c0_i32_0 : i32, i32, i32
  }
  func.func @transform_1(%arg0: i32, %arg1: i32) -> (i32, i32, i32) {
    %c0_i32 = arith.constant 0 : i32
    %c0_i32_0 = arith.constant 0 : i32
    %c0_i32_1 = arith.constant 0 : i32
    %c0_i32_2 = arith.constant 0 : i32
    return %c0_i32, %c0_i32_0, %c0_i32_1 : i32, i32, i32
  }
  func.func @transform_2(%arg0: i32, %arg1: i32) -> (i32, i32) {
    %c0_i32 = arith.constant 0 : i32
    %c0_i32_0 = arith.constant 0 : i32
    %c0_i32_1 = arith.constant 0 : i32
    return %c0_i32, %c0_i32_0 : i32, i32
  }
  func.func @transform_3(%arg0: i32, %arg1: i32) -> (i32, i32, i32) {
    %c0_i32 = arith.constant 0 : i32
    %c0_i32_0 = arith.constant 0 : i32
    %c0_i32_1 = arith.constant 0 : i32
    %c0_i32_2 = arith.constant 0 : i32
    return %c0_i32, %c0_i32_0, %c0_i32_1 : i32, i32, i32
  }
  func.func @transform_4(%arg0: i32, %arg1: i32) -> (i32, i32) {
    %c0_i32 = arith.constant 0 : i32
    %c0_i32_0 = arith.constant 0 : i32
    %c0_i32_1 = arith.constant 0 : i32
    return %c0_i32, %c0_i32_0 : i32, i32
  }
  func.func @transform_5(%arg0: i32, %arg1: i32) -> (i32, i32, i32) {
    %c0_i32 = arith.constant 0 : i32
    %c0_i32_0 = arith.constant 0 : i32
    return %arg0, %arg1, %c0_i32 : i32, i32, i32
  }
}

</mosaic_0001>

<bundles_post_ra>
// kernel: down_forward.1
= control target key start
LH: loop header
LB: loop body
LE: loop exit
PB: predicated region body
PF: predicated region fallthrough
CT: control target
= control target key end

     0   :  { %s4056_s18 = smov 0   ;;  %s4058_s19 = smov 0   ;;  %s5142_s0 = inlined_call_operand.vmem [shape: bf16[2,192,12], index: 0, kind: input, shape index: {}]   ;;  %s5143_s1 = inlined_call_operand.vmem [shape: bf16[3,12,128], index: 1, kind: input, shape index: {}]   ;;  %s5144_s2 = inlined_call_operand.vmem [shape: f32[1,128], index: 2, kind: input, shape index: {}]   ;;  %s5145_s3 = inlined_call_operand.vmem [shape: bf16[3,384,128], index: 3, kind: input, shape index: {}]   ;;  %s5146_s4 = inlined_call_operand.vmem [shape: f32[1,128], index: 4, kind: input, shape index: {}]   ;;  %s5147_s5 = inlined_call_operand.vmem [shape: f32[2,128,128], index: 5, kind: output, shape index: {}]  }
   0x1   :  { %s4060_s20 = smov 0  }
   0x2 LB: > { %s27_s21 = sadd.s32 1, %s4019_s19  ;;  %p3027_p0 = scmp.ge.s32.totalorder %s4023_s20, 1  ;;  %s4023_s20 = sphi %s4060_s20, %s15_s20   ;;  %s4019_s19 = sphi %s4058_s19, %s5189_s19   ;;  %s4015_s18 = sphi %s4056_s18, %s5188_s18  }
   0x3   : > { %p29_p1 = scmp.ge.s32.totalorder %s27_s21, 2  ;;  %p201_p2 = scmp.lt.s32.totalorder %s4023_s20, 3 }
   0x5   : > { %s5191_s21 = smov (%p29_p1, %s27_s21), 0  ;;  %p202_p3 = pnand %p3027_p0, %p201_p2 }
   0x6   : > { %p233_p4 = scmp.lt.s32.totalorder (!%p202_p3), %s4015_s18, 1 }
   0x7   : > { %205 = sbr.rel (%p202_p3) target bundleno = 648 (0x288), region = 40 }
   0xc   : > { %v3885_v0 = vld [vmem:[%s5143_s1 + $0x8] sm:$0x3f]   ;;  %vm390_vm0 = vcmask 1045504   ;;  %v3886_v2 = vld [vmem:[%s5143_s1] sm:$0x3f]   ;;  %s5193_s18 = smov (!%p233_p4, %s4015_s18), 1 }
   0xd   : > { %3856 = vmatprep.subr.msk.bf16.mxu0 %vm390_vm0, %v3885_v0  ;;  %v392_v1 = vsel %vm390_vm0, %v3885_v0, 0  ;;  %v3889_v3 = vld [vmem:[%s5143_s1 + $0x10] sm:$0x3f]   ;;  %3857 = vmatprep.subr.msk.bf16.mxu1 %vm390_vm0, %v3886_v2  ;;  %v593_v4 = vsel %vm390_vm0, %v3886_v2, 0  ;;  %s3859_s28 = smul.u32 96, %s5193_s18  ;;  %vm359_vm1 = vcmask 97280  }
   0xe   : > { %3695 = vmatpush3.bf16.msra.mxu0 %v392_v1  ;;  %3717 = vmatpush3.bf16.msra.mxu1 %v593_v4  ;;  %v822_v8 = vsel %vm390_vm0, %v3889_v3, 0  ;;  %v3918_v36 = vld [vmem:[%s5145_s3 + $0x138] sm:$0xff]   ;;  %v3925_v39 = vld [vmem:[%s5145_s3 + $0x170] sm:$0xff]   ;;  %v3927_v42 = vld [vmem:[%s5145_s3 + $0x168] sm:$0xff]   ;;  %v4025_v46 = vmov 0   ;;  %s3341_s8 = sshll.u32 %s5193_s18, 7 }
   0xf   : > { %3858 = vmatprep.subr.msk.bf16.mxu0 %vm390_vm0, %v3889_v3  ;;  %s4094_s6 = scalar_lea.vmem %s5142_s0, %s3859_s28  ;;  %3454 = vmatprep.subr.bf16.mxu1 %v3918_v36  ;;  %v3922_v37 = vld [vmem:[%s5145_s3 + $0x178] sm:$0xff]   ;;  %v3920_v40 = vld [vmem:[%s5145_s3 + $0x130] sm:$0xff]   ;;  %v3923_v43 = vld [vmem:[%s5145_s3 + $0x128] sm:$0xff]   ;;  %1485 = vst [vmem:[#allocation2 + $0x50] sm:$0xf] %v4025_v46  ;;  %s5061_s18 = scalar_lea.vmem %s5147_s5, %s3341_s8 }
  0x10   : > { %v3887_v5 = vld [vmem:[%s4094_s6 + $0x8] sm:$0xff]   ;;  %v3888_v6 = vld [vmem:[%s4094_s6] sm:$0xff]   ;;  %v3890_v7 = vld [vmem:[%s4094_s6 + $0x10] sm:$0xff]  }
  0x11   : > { %3696 = vmatprep.mubr.msk.bf16.mxu0 %vm359_vm1, %v3887_v5  ;;  %3718 = vmatprep.mubr.msk.bf16.mxu1 %vm359_vm1, %v3888_v6  ;;  %v3891_v9 = vld [vmem:[%s4094_s6 + $0x8] sm:$0xff]   ;;  %v3892_v10 = vld [vmem:[%s4094_s6 + $0x18] sm:$0xff]   ;;  %v3893_v11 = vld [vmem:[%s4094_s6 + $0x10] sm:$0xff]  }
  0x12   : > { %3697 = vmatmul.mubr.msk.bf16.vlgmr.msra.gmra.mxu0 %vm359_vm1, %v3890_v7  ;;  %3719 = vmatmul.mubr.msk.bf16.vlgmr.msra.gmra.mxu1 %vm359_vm1, %v3891_v9  ;;  %v3894_v12 = vld [vmem:[%s4094_s6 + $0x20] sm:$0xff]   ;;  %v3895_v13 = vld [vmem:[%s4094_s6 + $0x18] sm:$0xff]   ;;  %v3896_v14 = vld [vmem:[%s4094_s6 + $0x28] sm:$0xff]  }
  0x13   : > { %3739 = vmatpush3.bf16.msra.mxu0 %v822_v8  ;;  %3700 = vmatprep.mubr.msk.bf16.mxu0 %vm359_vm1, %v3892_v10  ;;  %v3897_v15 = vld [vmem:[%s4094_s6 + $0x20] sm:$0xff]   ;;  %v3898_v16 = vld [vmem:[%s4094_s6 + $0x30] sm:$0xff]   ;;  %v3899_v17 = vld [vmem:[%s4094_s6 + $0x28] sm:$0xff]  }
  0x14   : > { %3722 = vmatprep.mubr.msk.bf16.mxu1 %vm359_vm1, %v3893_v11  ;;  %v3900_v18 = vld [vmem:[%s4094_s6 + $0x38] sm:$0xff]   ;;  %v3901_v19 = vld [vmem:[%s4094_s6 + $0x30] sm:$0xff]   ;;  %v3902_v20 = vld [vmem:[%s4094_s6 + $0x40] sm:$0xff]   ;;  %3760 = vmatprep.subr.bf16.mxu0 %v3922_v37 }
  0x15   : > { %v3903_v21 = vld [vmem:[%s4094_s6 + $0x38] sm:$0xff]   ;;  %v3904_v22 = vld [vmem:[%s4094_s6 + $0x48] sm:$0xff]   ;;  %v3905_v23 = vld [vmem:[%s4094_s6 + $0x40] sm:$0xff]  }
  0x16   : > { %v3906_v24 = vld [vmem:[%s4094_s6 + $0x50] sm:$0xff]   ;;  %v3907_v25 = vld [vmem:[%s4094_s6 + $0x48] sm:$0xff]   ;;  %v3909_v27 = vld [vmem:[%s4094_s6 + $0x18] sm:$0xff]  }
  0x17   : > { %v3908_v26 = vld [vmem:[%s4094_s6 + $0x10] sm:$0xff]   ;;  %v3910_v28 = vld [vmem:[%s4094_s6 + $0x20] sm:$0xff]   ;;  %v3911_v29 = vld [vmem:[%s4094_s6 + $0x28] sm:$0xff]  }
  0x18   : > { %v3912_v30 = vld [vmem:[%s4094_s6 + $0x30] sm:$0xff]   ;;  %v3913_v31 = vld [vmem:[%s4094_s6 + $0x38] sm:$0xff]   ;;  %v3914_v32 = vld [vmem:[%s4094_s6 + $0x40] sm:$0xff]  }
  0x19   : > { %v3915_v33 = vld [vmem:[%s4094_s6 + $0x48] sm:$0xff]   ;;  %v3916_v34 = vld [vmem:[%s4094_s6 + $0x50] sm:$0xff]   ;;  %v3917_v35 = vld [vmem:[%s4094_s6 + $0x58] sm:$0xff]  }
  0x1a   : > { %3701 = vmatmul.mubr.msk.bf16.gmra.mxu0 %vm359_vm1, %v3894_v12  ;;  %3723 = vmatmul.mubr.msk.bf16.gmra.mxu1 %vm359_vm1, %v3895_v13  ;;  %v3919_v38 = vld [vmem:[%s5145_s3 + $0xf8] sm:$0xff]   ;;  %v3921_v41 = vld [vmem:[%s5145_s3 + $0xf0] sm:$0xff]   ;;  %v3924_v44 = vld [vmem:[%s5145_s3 + $0xe8] sm:$0xff]  }
  0x1b   : > { %3704 = vmatprep.mubr.msk.bf16.mxu0 %vm359_vm1, %v3896_v14  ;;  %3726 = vmatprep.mubr.msk.bf16.mxu1 %vm359_vm1, %v3897_v15  ;;  %v3929_v45 = vld [vmem:[%s5145_s3 + $0x160] sm:$0xff]   ;;  %v3932_v49 = vld [vmem:[%s5145_s3 + $0x158] sm:$0xff]   ;;  %v3935_v52 = vld [vmem:[%s5145_s3 + $0x150] sm:$0xff]  }
  0x1c   : > { %3455 = vmatpush3.bf16.msra.mxu1 %v3919_v38  ;;  %v3926_v47 = vld [vmem:[%s5145_s3 + $0x120] sm:$0xff]   ;;  %v3930_v50 = vld [vmem:[%s5145_s3 + $0x118] sm:$0xff]   ;;  %v3933_v53 = vld [vmem:[%s5145_s3 + $0x110] sm:$0xff]  }
  0x1d   : > { %3456 = vmatprep.subr.bf16.mxu1 %v3920_v40  ;;  %v3928_v48 = vld [vmem:[%s5145_s3 + $0xe0] sm:$0xff]   ;;  %v3931_v51 = vld [vmem:[%s5145_s3 + $0xd8] sm:$0xff]   ;;  %v3934_v54 = vld [vmem:[%s5145_s3 + $0xd0] sm:$0xff]  }
  0x1e   : > { %v3938_v55 = vld [vmem:[%s5145_s3 + $0x148] sm:$0xff]   ;;  %v3940_v58 = vld [vmem:[%s5145_s3 + $0x140] sm:$0xff]   ;;  %v4233_v61 = vld [vmem:[%s5145_s3 + $0xb8] sm:$0xff]  }
  0x1f   : > { %v3936_v56 = vld [vmem:[%s5145_s3 + $0x108] sm:$0xff]   ;;  %v3939_v59 = vld [vmem:[%s5145_s3 + $0x100] sm:$0xff]   ;;  %v3946_v62 = vld [vmem:[%s5145_s3 + $0x78] sm:$0xff]  }
  0x20   : > { %3457 = vmatpush3.bf16.msra.mxu1 %v3921_v41  ;;  %v3937_v57 = vld [vmem:[%s5145_s3 + $0xc8] sm:$0xff]   ;;  %v3941_v60 = vld [vmem:[%s5145_s3 + $0xc0] sm:$0xff]  }
  0x21   : > { %3458 = vmatprep.subr.bf16.mxu1 %v3923_v43  ;;  %v4299_v43 = vld [vmem:[%s5144_s2] ss:$0 sm:$0xff] }
  0x22   : > { %3705 = vmatmul.mubr.msk.bf16.gmra.mxu0 %vm359_vm1, %v3898_v16  ;;  %3727 = vmatmul.mubr.msk.bf16.gmra.mxu1 %vm359_vm1, %v3899_v17 }
  0x23   : > { %3708 = vmatprep.mubr.msk.bf16.mxu0 %vm359_vm1, %v3900_v18  ;;  %3730 = vmatprep.mubr.msk.bf16.mxu1 %vm359_vm1, %v3901_v19 }
  0x24   : > { %3459 = vmatpush3.bf16.msra.mxu1 %v3924_v44 }
  0x25   : > { %3460 = vmatprep.subr.bf16.mxu1 %v3926_v47 }
  0x28   : > { %3461 = vmatpush3.bf16.msra.mxu1 %v3928_v48 }
  0x29   : > { %3462 = vmatprep.subr.bf16.mxu1 %v3930_v50 }
  0x2a   : > { %3709 = vmatmul.mubr.msk.bf16.gmra.mxu0 %vm359_vm1, %v3902_v20  ;;  %3731 = vmatmul.mubr.msk.bf16.gmra.mxu1 %vm359_vm1, %v3903_v21 }
  0x2b   : > { %3712 = vmatprep.mubr.msk.bf16.mxu0 %vm359_vm1, %v3904_v22  ;;  %3734 = vmatprep.mubr.msk.bf16.mxu1 %vm359_vm1, %v3905_v23  ;;  %v957_v22 = vlaneseq }
  0x2c   : > { %3463 = vmatpush3.bf16.msra.mxu1 %v3931_v51 }
  0x2d   : > { %3464 = vmatprep.subr.bf16.mxu1 %v3933_v53 }
  0x30   : > { %3465 = vmatpush3.bf16.msra.mxu1 %v3934_v54 }
  0x31   : > { %3466 = vmatprep.subr.bf16.mxu1 %v3936_v56 }
  0x32   : > { %3713 = vmatmul.mubr.msk.bf16.gmra.mxu0 %vm359_vm1, %v3906_v24  ;;  %3735 = vmatmul.mubr.msk.bf16.gmra.mxu1 %vm359_vm1, %v3907_v25 }
  0x33   : > { %3740 = vmatprep.mubr.msk.bf16.mxu0 %vm359_vm1, %v3908_v26  ;;  %v4275_v26 = vshrl.u32 %v957_v22, 7 }
  0x34   : > { %3467 = vmatpush3.bf16.msra.mxu1 %v3937_v57 }
  0x35   : > { %3468 = vmatprep.subr.bf16.mxu1 %v3939_v59  ;;  %v964_v40 = vadd.s32 48, %v4275_v26  ;;  %v963_v54 = vadd.s32 40, %v4275_v26 }
  0x38   : > { %3469 = vmatpush3.bf16.msra.mxu1 %v3941_v60 }
  0x39   : > { %3534 = vmatprep.subr.bf16.mxu1 %v3946_v62 }
  0x3a   : > { %3741 = vmatmul.mubr.msk.bf16.vlgmr.msra.gmra.mxu0 %vm359_vm1, %v3909_v27 }
  0x3b   : > { %3744 = vmatprep.mubr.msk.bf16.mxu0 %vm359_vm1, %v3910_v28  ;;  %3761 = vmatpush3.bf16.msra.mxu0 %v3922_v37  ;;  %v982_v37 = vand.u32 15, %v4275_v26 }
  0x3c   : > { %3762 = vmatprep.subr.bf16.mxu0 %v3925_v39 }
  0x3d   : > { %vm4307_vm3 = vcmp.ge.s32.totalorder %v982_v37, 1  ;;  %v4330_v37 = vadd.s32 72, %v4275_v26 }
  0x3f   : > { %3763 = vmatpush3.bf16.msra.mxu0 %v3925_v39 }
  0x40   : > { %3764 = vmatprep.subr.bf16.mxu0 %v3927_v42 }
  0x42   : > { %3745 = vmatmul.mubr.msk.bf16.gmra.mxu0 %vm359_vm1, %v3911_v29 }
  0x43   : > { %3748 = vmatprep.mubr.msk.bf16.mxu0 %vm359_vm1, %v3912_v30  ;;  %3765 = vmatpush3.bf16.msra.mxu0 %v3927_v42  ;;  %v960_v30 = vadd.s32 16, %v4275_v26 }
  0x44   : > { %3766 = vmatprep.subr.bf16.mxu0 %v3929_v45 }
  0x45   : > { %v996_v36 = vand.u32 15, %v960_v30 }
  0x47   : > { %3767 = vmatpush3.bf16.msra.mxu0 %v3929_v45  ;;  %v965_v45 = vadd.s32 56, %v4275_v26  ;;  %vm4303_vm2 = vcmp.ge.s32.totalorder %v996_v36, 1  ;;  %v969_v36 = vadd.s32 88, %v4275_v26 }
  0x48   : > { %3768 = vmatprep.subr.bf16.mxu0 %v3932_v49 }
  0x4a   : > { %3749 = vmatmul.mubr.msk.bf16.gmra.mxu0 %vm359_vm1, %v3913_v31  ;;  %v961_v31 = vadd.s32 24, %v4275_v26 }
  0x4b   : > { %3752 = vmatprep.mubr.msk.bf16.mxu0 %vm359_vm1, %v3914_v32  ;;  %3769 = vmatpush3.bf16.msra.mxu0 %v3932_v49  ;;  %v962_v49 = vadd.s32 32, %v4275_v26 }
  0x4c   : > { %3770 = vmatprep.subr.bf16.mxu0 %v3935_v52  ;;  %v1003_v38 = vand.u32 15, %v961_v31 }
  0x4d   : > { %v1010_v22 = vand.u32 15, %v962_v49 }
  0x4e   : > { %vm4311_vm4 = vcmp.le.s32.totalorder %v1003_v38, 8 }
  0x4f   : > { %3771 = vmatpush3.bf16.msra.mxu0 %v3935_v52  ;;  %vm4353_vm8 = vcmp.ge.s32.totalorder %v1010_v22, 1 }
  0x50   : > { %3772 = vmatprep.subr.bf16.mxu0 %v3938_v55 }
  0x52   : > { %3753 = vmatmul.mubr.msk.bf16.gmra.mxu0 %vm359_vm1, %v3915_v33 }
  0x53   : > { %3756 = vmatprep.mubr.msk.bf16.mxu0 %vm359_vm1, %v3916_v34  ;;  %3773 = vmatpush3.bf16.msra.mxu0 %v3938_v55  ;;  %v959_v34 = vadd.s32 8, %v4275_v26 }
  0x54   : > { %3774 = vmatprep.subr.bf16.mxu0 %v3940_v58 }
  0x55   : > { %v989_v44 = vand.u32 15, %v959_v34  ;;  %v1017_v34 = vand.u32 15, %v963_v54 }
  0x57   : > { %3775 = vmatpush3.bf16.msra.mxu0 %v3940_v58  ;;  %v1024_v58 = vand.u32 15, %v964_v40  ;;  %vm4319_vm5 = vcmp.le.s32.totalorder %v989_v44, 8  ;;  %vm4357_vm9 = vcmp.le.s32.totalorder %v1017_v34, 8 }
  0x58   : > { %3792 = vmatprep.subr.bf16.mxu0 %v4233_v61 }
  0x59   : > { %vm4335_vm6 = vcmp.ge.s32.totalorder %v1024_v58, 1  ;;  %v1045_v58 = vand.u32 15, %v4330_v37  ;;  %v4380_v37 = vadd.s32 104, %v4275_v26 }
  0x5a   : > { %3757 = vmatmul.mubr.msk.bf16.gmra.mxu0 %vm359_vm1, %v3917_v35 }
  0x5b   : > { %vm4409_vm13 = vcmp.le.s32.totalorder %v1045_v58, 8  ;;  %v4420_v58 = vadd.s32 144, %v4275_v26 }
  0xd2   : > { %v3698_v63 = vpop.f32.mrf.mxu0  ;;  %v3720_v0 = vpop.f32.mrf.mxu1 }
  0xd3   : > { %v638_v39 = vadd.f32 %v3720_v0, %v3698_v63  ;;  %v1031_v63 = vand.u32 15, %v965_v45  ;;  %v968_v0 = vadd.s32 80, %v4275_v26 }
  0xd4   : > { %v428_v1 = vpop.f32.mrf.mxu0  ;;  %v629_v2 = vpop.f32.mrf.mxu1 }
  0xd5   : > { %v630_v47 = vadd.f32 %v629_v2, %v428_v1  ;;  %v4325_v1 = vadd.s32 64, %v4275_v26  ;;  %vm4343_vm7 = vcmp.le.s32.totalorder %v1031_v63, 8 }
  0xd6   : > { %v3699_v3 = vpop.f32.mrf.mxu0  ;;  %v3721_v4 = vpop.f32.mrf.mxu1 }
  0xd7   : > { %v641_v55 = vadd.f32 %v3721_v4, %v3699_v3 }
  0xd8   : > { %v431_v5 = vpop.f32.mrf.mxu0  ;;  %v632_v6 = vpop.f32.mrf.mxu1 }
  0xd9   : > { %v633_v2 = vadd.f32 %v632_v6, %v431_v5 }
  0xda   : > { %v4239_v7 = vpop.f32.mrf.mxu0  ;;  %v4241_v8 = vpop.f32.mrf.mxu1 }
  0xdb   : > { %v654_v38 = vadd.f32 %v4241_v8, %v4239_v7  ;;  %v1038_v7 = vand.u32 15, %v4325_v1 }
  0xdc   : > { %v4243_v9 = vpop.f32.mrf.mxu0  ;;  %v4245_v10 = vpop.f32.mrf.mxu1 }
  0xdd   : > { %v646_v6 = vadd.f32 %v4245_v10, %v4243_v9  ;;  %vm4401_vm12 = vcmp.ge.s32.totalorder %v1038_v7, 1 }
  0xde   : > { %v4247_v11 = vpop.f32.mrf.mxu0  ;;  %v4251_v13 = vpop.f32.mrf.mxu1 }
  0xdf   : > { %v657_v54 = vadd.f32 %v4251_v13, %v4247_v11 }
  0xe0   : > { %v4249_v12 = vpop.f32.mrf.mxu0  ;;  %v4257_v16 = vpop.f32.mrf.mxu1 }
  0xe1   : > { %v649_v50 = vadd.f32 %v4257_v16, %v4249_v12 }
  0xe2   : > { %v4253_v14 = vpop.f32.mrf.mxu0  ;;  %v4263_v19 = vpop.f32.mrf.mxu1 }
  0xe4   : > { %v4255_v15 = vpop.f32.mrf.mxu0  ;;  %v4269_v23 = vpop.f32.mrf.mxu1 }
  0xe6   : > { %v4259_v17 = vpop.f32.mrf.mxu0  ;;  %v4277_v27 = vpop.f32.mrf.mxu1 }
  0xe8   : > { %v4261_v18 = vpop.f32.mrf.mxu0  ;;  %v4285_v32 = vpop.f32.mrf.mxu1 }
  0xea   : > { %v4265_v20 = vpop.f32.mrf.mxu0  ;;  %v4294_v41 = vpop.f32.mrf.mxu1 }
  0xec   : > { %v4267_v21 = vpop.f32.mrf.mxu0  ;;  %v4317_v59 = vpop.f32.mrf.mxu1 }
  0xee   : > { %v4271_v24 = vpop.f32.mrf.mxu0 }
  0xf0   : > { %v4273_v25 = vpop.f32.mrf.mxu0 }
  0xf2   : > { %v4279_v28 = vpop.f32.mrf.mxu0 }
  0xf4   : > { %v4281_v29 = vpop.f32.mrf.mxu0 }
  0xf6   : > { %v4287_v33 = vpop.f32.mrf.mxu0 }
  0xf8   : > { %v4290_v35 = vpop.f32.mrf.mxu0 }
  0xfa   : > { %v3742_v42 = vpop.f32.mrf.mxu0 }
  0xfb   : > { %v939_v48 = vadd.f32 %v3742_v42, %v638_v39  ;;  %v4341_v42 = vpop.f32.mrf.mxu1 }
  0xfc   : > { %v858_v51 = vpop.f32.mrf.mxu0 }
  0xfd   : > { %v1287_v56 = vadd.f32 %v4299_v43, %v939_v48  ;;  %v937_v57 = vadd.f32 %v858_v51, %v630_v47  ;;  %v1052_v47 = vand.u32 15, %v968_v0  ;;  %v4367_v0 = vpop.f32.mrf.mxu1 }
  0xfe   : > { %v3743_v60 = vpop.f32.mrf.mxu0 }
  0xff   : > { %v1285_v3 = vadd.f32 %v4299_v43, %v937_v57  ;;  %v940_v4 = vadd.f32 %v3743_v60, %v641_v55  ;;  %v1307_v30 = vmax.f32 %v1287_v56, 0.0  ;;  %v1059_v57 = vand.u32 15, %v969_v36 }
 0x100   : > { %v861_v31 = vpop.f32.mrf.mxu0  ;;  %v973_v36 = vadd.s32 120, %v4275_v26  ;;  %vm4385_vm10 = vcmp.ge.s32.totalorder %v1052_v47, 1  ;;  %v686_v55 = vadd.f32 %v4294_v41, %v4265_v20  ;;  %v678_v41 = vadd.f32 %v4317_v59, %v4267_v21 }
 0x101   : > { %v1288_v39 = vadd.f32 %v4299_v43, %v940_v4  ;;  %v938_v40 = vadd.f32 %v861_v31, %v633_v2  ;;  %v1305_v8 = vmax.f32 %v1285_v3, 0.0  ;;  %v1367_v9 = vsel %vm4303_vm2, %v1307_v30, 0.0 }
 0x102   : > { %v3746_v44 = vpop.f32.mrf.mxu0  ;;  %v972_v3 = vadd.s32 112, %v4275_v26  ;;  %v4371_v4 = vadd.s32 96, %v4275_v26  ;;  %vm4393_vm11 = vcmp.le.s32.totalorder %v1059_v57, 8  ;;  %v1087_v57 = vand.u32 15, %v973_v36 }
 0x103   : > { %v1308_v48 = vmax.f32 %v1288_v39, 0.0  ;;  %v1286_v49 = vadd.f32 %v4299_v43, %v938_v40  ;;  %v943_v51 = vadd.f32 %v3746_v44, %v654_v38  ;;  %v1365_v53 = vsel %vm4307_vm3, %v1305_v8, 0.0 }
 0x104   : > { %v874_v10 = vpop.f32.mrf.mxu0  ;;  %v670_v38 = vadd.f32 %v4263_v19, %v4253_v14  ;;  %v662_v40 = vadd.f32 %v4269_v23, %v4255_v15  ;;  %v1066_v14 = vand.u32 15, %v4371_v4  ;;  %vm4445_vm15 = vcmp.le.s32.totalorder %v1087_v57, 8 }
 0x105   : > { %v1368_v60 = vsel %vm4311_vm4, %v1308_v48, 0.0  ;;  %v1306_v63 = vmax.f32 %v1286_v49, 0.0  ;;  %v1291_v11 = vadd.f32 %v4299_v43, %v943_v51  ;;  %v941_v13 = vadd.f32 %v874_v10, %v646_v6  ;;  %v4391_v6 = vpop.f32.mrf.mxu1 }
 0x106   : > { %v3370_v1 = vpack.c.bf16 %v1368_v60, %v1367_v9  ;;  %v3747_v2 = vpop.f32.mrf.mxu0  ;;  %v1080_v48 = vand.u32 15, %v972_v3  ;;  %v673_v51 = vadd.f32 %v4277_v27, %v4259_v17  ;;  %v1073_v60 = vand.u32 15, %v4380_v37 }
 0x107   : > { %v1366_v22 = vsel %vm4319_vm5, %v1306_v63, 0.0  ;;  %v1289_v30 = vadd.f32 %v4299_v43, %v941_v13  ;;  %v944_v31 = vadd.f32 %v3747_v2, %v657_v54  ;;  %v1311_v16 = vmax.f32 %v1291_v11, 0.0  ;;  %v693_v27 = vpop.f32.mrf.mxu1 }
 0x108   : > { %3412 = vst [vmem:[#allocation2 + $0x8] sm:$0xff] %v3370_v1   ;;  %v3365_v12 = vpack.c.bf16 %v1366_v22, %v1365_v53  ;;  %v877_v34 = vpop.f32.mrf.mxu0  ;;  %v665_v17 = vadd.f32 %v4285_v32, %v4261_v18  ;;  %v4423_v1 = vadd.s32 128, %v4275_v26  ;;  %v4431_v22 = vadd.s32 152, %v4275_v26 }
 0x109   : > { %v1292_v52 = vadd.f32 %v4299_v43, %v944_v31  ;;  %v942_v39 = vadd.f32 %v877_v34, %v649_v50  ;;  %v1309_v19 = vmax.f32 %v1289_v30, 0.0  ;;  %v1371_v54 = vsel %vm4335_vm6, %v1311_v16, 0.0  ;;  %v3737_v34 = vpop.f32.mrf.mxu1 }
 0x10a   : > { %3366 = vst [vmem:[#allocation2] sm:$0xff] %v3365_v12   ;;  %v3750_v44 = vpop.f32.mrf.mxu0  ;;  %v4436_v31 = vadd.s32 136, %v4275_v26  ;;  %vm4441_vm14 = vcmp.ge.s32.totalorder %v1080_v48, 1  ;;  %v1108_v26 = vand.u32 15, %v4420_v58  ;;  %v689_v48 = vadd.f32 %v4341_v42, %v4271_v24 }
 0x10b   : > { %1490 = vst [vmem:[#allocation2] sm:$0xf] %v4025_v46  ;;  %1491 = vst [vmem:[#allocation2 + $0x4] sm:$0xf] %v4025_v46  ;;  %v1312_v47 = vmax.f32 %v1292_v52, 0.0  ;;  %v1290_v49 = vadd.f32 %v4299_v43, %v942_v39  ;;  %v947_v15 = vadd.f32 %v3750_v44, %v670_v38  ;;  %v1369_v45 = vsel %vm4353_vm8, %v1309_v19, 0.0 }
 0x10c   : > { %v890_v9 = vpop.f32.mrf.mxu0  ;;  %v1094_v52 = vand.u32 15, %v4423_v1  ;;  %vm4459_vm0 = vcmp.ge.s32.totalorder %v1066_v14, 1  ;;  %vm4463_vm1 = vcmp.le.s32.totalorder %v1073_v60, 8  ;;  %v1115_v21 = vand.u32 15, %v4431_v22  ;;  %v3947_v38 = vld [vmem:[%s5145_s3 + $0x38] sm:$0xff]   ;;  %v3951_v1 = vld [vmem:[%s5145_s3 + $0xa8] sm:$0xff]  }
 0x10d   : > { %v1372_v7 = vsel %vm4343_vm7, %v1312_v47, 0.0  ;;  %v1310_v63 = vmax.f32 %v1290_v49, 0.0  ;;  %v1295_v11 = vadd.f32 %v4299_v43, %v947_v15  ;;  %v945_v13 = vadd.f32 %v890_v9, %v662_v40  ;;  %v3952_v15 = vld [vmem:[%s5145_s3 + $0x70] sm:$0xff]  }
 0x10e   : > { %v3380_v5 = vpack.c.bf16 %v1372_v7, %v1371_v54  ;;  %v3751_v50 = vpop.f32.mrf.mxu0  ;;  %v1101_v59 = vand.u32 15, %v4436_v31  ;;  %vm1673_vm2 = vcmask 1046528   ;;  %v681_v14 = vadd.f32 %v4367_v0, %v4273_v25  ;;  %v696_v54 = vpop.f32.mrf.mxu1 }
 0x10f   : > { %v1370_v2 = vsel %vm4357_vm9, %v1310_v63, 0.0  ;;  %v1293_v3 = vadd.f32 %v4299_v43, %v945_v13  ;;  %v948_v4 = vadd.f32 %v3751_v50, %v673_v51  ;;  %v1315_v32 = vmax.f32 %v1295_v11, 0.0  ;;  %v4433_v30 = vld [vmem:[#allocation2 + $0x8] sm:$0xff]  }
 0x110   : > { %3414 = vst [vmem:[#allocation2 + $0x18] sm:$0xff] %v3380_v5   ;;  %v3375_v18 = vpack.c.bf16 %v1370_v2, %v1369_v45  ;;  %v893_v53 = vpop.f32.mrf.mxu0  ;;  %v1587_v20 = vshll.u32 %v4433_v30, 16  ;;  %vm1578_vm3 = vsmask.f32 7424  ;;  %v694_v25 = vadd.f32 %v693_v27, %v4281_v29 }
 0x111   : > { %v1296_v56 = vadd.f32 %v4299_v43, %v948_v4  ;;  %v946_v12 = vadd.f32 %v893_v53, %v665_v17  ;;  %v1313_v36 = vmax.f32 %v1293_v3, 0.0  ;;  %v1375_v19 = vsel %vm4385_vm10, %v1315_v32, 0.0 }
 0x112   : > { %3413 = vst [vmem:[#allocation2 + $0x10] sm:$0xff] %v3375_v18   ;;  %v3754_v37 = vpop.f32.mrf.mxu0  ;;  %v4476_v7 = vrot.slane %v1587_v20, 1  ;;  %v702_v17 = vadd.f32 %v4391_v6, %v4279_v28  ;;  %v1591_v50 = vshrl.u32 %v4433_v30, 16  ;;  %v705_v10 = vadd.f32 %v3737_v34, %v4287_v33 }
 0x113   : > { %v1316_v39 = vmax.f32 %v1296_v56, 0.0  ;;  %v1294_v40 = vadd.f32 %v4299_v43, %v946_v12  ;;  %v951_v44 = vadd.f32 %v3754_v37, %v686_v55  ;;  %v1373_v9 = vsel %vm4401_vm12, %v1313_v36, 0.0 }
 0x114   : > { %v906_v47 = vpop.f32.mrf.mxu0  ;;  %v697_v45 = vadd.f32 %v696_v54, %v4290_v35  ;;  %v1675_v4 = vrot.slane %v4433_v30, 1  ;;  %v1593_v18 = vor.u32 %v1591_v50, %v4476_v7  ;;  %vm4541_vm4 = vcmp.ge.s32.totalorder %v1108_v26, 1 }
 0x115   : > { %v1376_v51 = vsel %vm4393_vm11, %v1316_v39, 0.0  ;;  %v1314_v24 = vmax.f32 %v1294_v40, 0.0  ;;  %v1299_v42 = vadd.f32 %v4299_v43, %v951_v44  ;;  %v949_v62 = vadd.f32 %v906_v47, %v678_v41  ;;  %v3948_v47 = vld [vmem:[%s5145_s3 + $0xb0] sm:$0xff]  }
 0x116   : > { %v3390_v57 = vpack.c.bf16 %v1376_v51, %v1375_v19  ;;  %v3755_v60 = vpop.f32.mrf.mxu0  ;;  %vm4547_vm5 = vcmp.ge.s32.totalorder %v1094_v52, 1  ;;  %vm4553_vm6 = vcmp.le.s32.totalorder %v1115_v21, 8  ;;  %vm4568_vm7 = vcmp.le.s32.totalorder %v1101_v59, 8  ;;  %v3953_v21 = vld [vmem:[%s5145_s3 + $0x30] sm:$0xff]  }
 0x117   : > { %v1374_v8 = vsel %vm4409_vm13, %v1314_v24, 0.0  ;;  %v1319_v63 = vmax.f32 %v1299_v42, 0.0  ;;  %v1297_v11 = vadd.f32 %v4299_v43, %v949_v62  ;;  %v952_v13 = vadd.f32 %v3755_v60, %v689_v48  ;;  %v4484_v5 = vld [vmem:[#allocation2 + $0x18] sm:$0xff]  }
 0x118   : > { %3416 = vst [vmem:[#allocation2 + $0x28] sm:$0xff] %v3390_v57   ;;  %v3385_v0 = vpack.c.bf16 %v1374_v8, %v1373_v9  ;;  %v909_v23 = vpop.f32.mrf.mxu0  ;;  %v1679_v35 = vrot.slane %v4484_v5, 1  ;;  %v1603_v34 = vshll.u32 %v4484_v5, 16  ;;  %v1607_v31 = vshrl.u32 %v4484_v5, 16 }
 0x119   : > { %v1300_v2 = vadd.f32 %v4299_v43, %v952_v13  ;;  %v950_v3 = vadd.f32 %v909_v23, %v681_v14  ;;  %v1379_v28 = vsel %vm4441_vm14, %v1319_v63, 0.0  ;;  %v1317_v6 = vmax.f32 %v1297_v11, 0.0  ;;  %v4492_v27 = vld [vmem:[#allocation2 + $0x10] sm:$0xff]  }
 0x11a   : > { %3415 = vst [vmem:[#allocation2 + $0x20] sm:$0xff] %v3385_v0   ;;  %v3758_v29 = vpop.f32.mrf.mxu0  ;;  %v1677_v56 = vrot.slane %v4492_v27, 1  ;;  %v1595_v12 = vshll.u32 %v4492_v27, 16  ;;  %v1599_v16 = vshrl.u32 %v4492_v27, 16  ;;  %v1605_v60 = vrot.slane %v1603_v34, 1 }
 0x11b   : > { %v1320_v32 = vmax.f32 %v1300_v2, 0.0  ;;  %v1298_v33 = vadd.f32 %v4299_v43, %v950_v3  ;;  %v955_v53 = vadd.f32 %v3758_v29, %v702_v17  ;;  %v1377_v51 = vsel %vm4459_vm0, %v1317_v6, 0.0  ;;  %v3977_v17 = vld [vmem:[%s5145_s3 + $0x10] sm:$0xff]  }
 0x11c   : > { %v922_v55 = vpop.f32.mrf.mxu0  ;;  %v4508_v44 = vsel %vm1673_vm2, %v1675_v4, %v1677_v56  ;;  %v4513_v48 = vsel %vm1673_vm2, %v1677_v56, %v1679_v35  ;;  %v1597_v19 = vrot.slane %v1595_v12, 1  ;;  %v1609_v56 = vor.u32 %v1607_v31, %v1605_v60  ;;  %v3964_v12 = vld [vmem:[%s5145_s3 + $0x60] sm:$0xff]   ;;  %v3983_v31 = vld [vmem:[%s5145_s3 + $0x8] sm:$0xff]  }
 0x11d   : > { %v1380_v36 = vsel %vm4445_vm15, %v1320_v32, 0.0  ;;  %v1318_v37 = vmax.f32 %v1298_v33, 0.0  ;;  %v1303_v20 = vadd.f32 %v4299_v43, %v955_v53  ;;  %v953_v41 = vadd.f32 %v922_v55, %v694_v25  ;;  %3776 = vmatprep.mubr.bf16.mxu0 %v4508_v44  ;;  %v3954_v32 = vld [vmem:[%s5145_s3 + $0xa0] sm:$0xff]   ;;  %v3959_v33 = vld [vmem:[%s5145_s3 + $0x28] sm:$0xff]  }
 0x11e   : > { %v3400_v39 = vpack.c.bf16 %v1380_v36, %v1379_v28  ;;  %v3759_v40 = vpop.f32.mrf.mxu0  ;;  %3777 = vmatmul.mubr.bf16.vlgmr.msra.gmra.mxu0 %v4513_v48  ;;  %v4529_v9 = vsel %vm1578_vm3, %v1593_v18, %v1597_v19  ;;  %v1601_v57 = vor.u32 %v1599_v16, %v1597_v19  ;;  %v3957_v36 = vld [vmem:[%s5145_s3 + $0x98] sm:$0xff]  }
 0x11f   : > { %v1378_v24 = vsel %vm4463_vm1, %v1318_v37, 0.0  ;;  %v1301_v42 = vadd.f32 %v4299_v43, %v953_v41  ;;  %v956_v62 = vadd.f32 %v3759_v40, %v705_v10  ;;  %v4531_v49 = vld [vmem:[#allocation2 + $0x28] sm:$0xff]   ;;  %v1323_v8 = vmax.f32 %v1303_v20, 0.0  ;;  %1978 = vmatprep.mubr.bf16.mxu1 %v4529_v9  ;;  %3793 = vmatpush3.bf16.msra.mxu0 %v4233_v61  ;;  %v3966_v20 = vld [vmem:[%s5145_s3 + $0x20] sm:$0xff]   ;;  %v3969_v40 = vld [vmem:[%s5145_s3 + $0x58] sm:$0xff]  }
 0x120   : > { %3418 = vst [vmem:[#allocation2 + $0x38] sm:$0xff] %v3400_v39   ;;  %v3395_v14 = vpack.c.bf16 %v1378_v24, %v1377_v51  ;;  %v925_v54 = vpop.f32.mrf.mxu0  ;;  %1979 = vmatmul.mubr.bf16.vlgmr.msra.gmra.mxu1 %v4433_v30  ;;  %v4559_v61 = vsel %vm1578_vm3, %v1601_v57, %v1605_v60  ;;  %3794 = vmatprep.subr.bf16.mxu0 %v3948_v47  ;;  %v1683_v50 = vrot.slane %v4531_v49, 1  ;;  %v1619_v39 = vshll.u32 %v4531_v49, 16  ;;  %v3960_v51 = vld [vmem:[%s5145_s3 + $0x90] sm:$0xff]   ;;  %v3971_v24 = vld [vmem:[%s5145_s3 + $0x18] sm:$0xff]  }
 0x121   : > { %v1321_v63 = vmax.f32 %v1301_v42, 0.0  ;;  %v1304_v11 = vadd.f32 %v4299_v43, %v956_v62  ;;  %v954_v13 = vadd.f32 %v925_v54, %v697_v45  ;;  %v4561_v58 = vld [vmem:[#allocation2 + $0x20] sm:$0xff]   ;;  %3535 = vmatpush3.bf16.msra.mxu1 %v3947_v38  ;;  %1986 = vmatprep.mubr.bf16.mxu1 %v4559_v61  ;;  %v1383_v10 = vsel %vm4541_vm4, %v1323_v8, 0.0  ;;  %v3975_v62 = vld [vmem:[%s5145_s3 + $0x50] sm:$0xff]  }
 0x122   : > { %3417 = vst [vmem:[#allocation2 + $0x30] sm:$0xff] %v3395_v14   ;;  %v1681_v23 = vrot.slane %v4561_v58, 1  ;;  %3536 = vmatprep.subr.bf16.mxu1 %v3952_v15  ;;  %v1611_v59 = vshll.u32 %v4561_v58, 16  ;;  %v1615_v41 = vshrl.u32 %v4561_v58, 16  ;;  %v4648_v42 = vld [vmem:[#allocation2] sm:$0xff]   ;;  %v1621_v54 = vrot.slane %v1619_v39, 1 }
 0x123   : > { %v1324_v26 = vmax.f32 %v1304_v11, 0.0  ;;  %v1302_v52 = vadd.f32 %v4299_v43, %v954_v13  ;;  %v3958_v43 = vld [vmem:[%s5145_s3 + $0x68] sm:$0xff]   ;;  %v1381_v45 = vsel %vm4547_vm5, %v1321_v63, 0.0  ;;  %3795 = vmatpush3.bf16.msra.mxu0 %v3948_v47  ;;  %v4653_v14 = vld [vmem:[#allocation2 + $0x50] ss:$0 sps:$4 sm:$0xff]   ;;  %v1674_v0 = vrot.slane %v4648_v42, 1 }
 0x124   : > { %v4593_v6 = vsel %vm1673_vm2, %v1679_v35, %v1681_v23  ;;  %v4596_v29 = vsel %vm1673_vm2, %v1681_v23, %v1683_v50  ;;  %3796 = vmatprep.subr.bf16.mxu0 %v3951_v1  ;;  %v1613_v18 = vrot.slane %v1611_v59, 1  ;;  %v3963_v63 = vld [vmem:[%s5145_s3 + $0x88] sm:$0xff]   ;;  %v1693_v25 = vrot.slane %v4653_v14, 1 }
 0x125   : > { %v1384_v2 = vsel %vm4553_vm6, %v1324_v26, 0.0  ;;  %v1322_v3 = vmax.f32 %v1302_v52, 0.0  ;;  %3780 = vmatprep.mubr.bf16.mxu0 %v4593_v6  ;;  %3537 = vmatpush3.bf16.msra.mxu1 %v3953_v21  ;;  %v1623_v21 = vshrl.u32 %v4531_v49, 16  ;;  %v1676_v59 = vsel %vm1673_vm2, %v1674_v0, %v1675_v4  ;;  %v3989_v4 = vld [vmem:[%s5145_s3] sm:$0xff]   ;;  %v3986_v0 = vld [vmem:[%s5145_s3 + $0x1c8] sm:$0xff]  }
 0x126   : > { %v3410_v28 = vpack.c.bf16 %v1384_v2, %v1383_v10  ;;  %3781 = vmatmul.mubr.bf16.gmra.mxu0 %v4596_v29  ;;  %3538 = vmatprep.subr.bf16.mxu1 %v3958_v43  ;;  %v4619_v34 = vsel %vm1578_vm3, %v1609_v56, %v1613_v18  ;;  %v1617_v47 = vor.u32 %v1615_v41, %v1613_v18  ;;  %v3987_v10 = vld [vmem:[%s5145_s3 + $0x40] sm:$0xff]   ;;  %v3968_v2 = vld [vmem:[%s5145_s3 + $0x1f8] sm:$0xff]   ;;  %v3973_v56 = vld [vmem:[%s5145_s3 + $0x1b0] sm:$0xff]  }
 0x127   : > { %v1382_v53 = vsel %vm4568_vm7, %v1322_v3, 0.0  ;;  %v4607_v35 = vld [vmem:[#allocation2 + $0x38] sm:$0xff]   ;;  %3797 = vmatpush3.bf16.msra.mxu0 %v3951_v1  ;;  %v3981_v1 = vld [vmem:[%s5145_s3 + $0x48] sm:$0xff]   ;;  %v1625_v43 = vor.u32 %v1623_v21, %v1621_v54  ;;  %v3978_v41 = vld [vmem:[%s5145_s3 + $0x1e0] sm:$0xff]  }
 0x128   : > { %3420 = vst [vmem:[#allocation2 + $0x48] sm:$0xff] %v3410_v28   ;;  %v3405_v55 = vpack.c.bf16 %v1382_v53, %v1381_v45  ;;  %1987 = vmatmul.mubr.bf16.gmra.mxu1 %v4492_v27  ;;  %3798 = vmatprep.subr.bf16.mxu0 %v3954_v32  ;;  %v4662_v15 = vsel %vm1578_vm3, %v1617_v47, %v1621_v54  ;;  %v1635_v28 = vshll.u32 %v4607_v35, 16  ;;  %v4719_v18 = vld [vmem:[%s5145_s3 + $0x238] sm:$0xff]   ;;  %v3972_v53 = vld [vmem:[%s5145_s3 + $0x1f0] sm:$0xff]  }
 0x129   : > { %1492 = vst [vmem:[#allocation2 + $0x48] sm:$0xf] %v4025_v46  ;;  %1493 = vst [vmem:[#allocation2 + $0x4c] sm:$0xf] %v4025_v46  ;;  %v4615_v16 = vld [vmem:[#allocation2 + $0x30] sm:$0xff]   ;;  %1994 = vmatprep.mubr.bf16.mxu1 %v4619_v34  ;;  %v1687_v46 = vrot.slane %v4607_v35, 1  ;;  %3539 = vmatpush3.bf16.msra.mxu1 %v3959_v33 }
 0x12a   : > { %3419 = vst [vmem:[#allocation2 + $0x40] sm:$0xff] %v3405_v55   ;;  %v1685_v37 = vrot.slane %v4615_v16, 1  ;;  %3540 = vmatprep.subr.bf16.mxu1 %v3964_v12  ;;  %v1627_v11 = vshll.u32 %v4615_v16, 16  ;;  %v1631_v3 = vshrl.u32 %v4615_v16, 16  ;;  %v1637_v55 = vrot.slane %v1635_v28, 1  ;;  %v3982_v54 = vld [vmem:[%s5145_s3 + $0x198] sm:$0xff]  }
 0x12b   : > { %3799 = vmatpush3.bf16.msra.mxu0 %v3954_v32  ;;  %v3970_v32 = vld [vmem:[%s5145_s3 + $0x1b8] sm:$0xff]  }
 0x12c   : > { %v4636_v19 = vsel %vm1673_vm2, %v1683_v50, %v1685_v37  ;;  %v4639_v38 = vsel %vm1673_vm2, %v1685_v37, %v1687_v46  ;;  %3800 = vmatprep.subr.bf16.mxu0 %v3957_v36  ;;  %v1629_v23 = vrot.slane %v1627_v11, 1  ;;  %v3967_v50 = vld [vmem:[%s5145_s3 + $0x80] sm:$0xff]   ;;  %v3976_v37 = vld [vmem:[%s5145_s3 + $0x1a8] sm:$0xff]   ;;  %v3984_v11 = vld [vmem:[%s5145_s3 + $0x1d0] sm:$0xff]  }
 0x12d   : > { %3784 = vmatprep.mubr.bf16.mxu0 %v4636_v19  ;;  %3541 = vmatpush3.bf16.msra.mxu1 %v3966_v20 }
 0x12e   : > { %3785 = vmatmul.mubr.bf16.gmra.mxu0 %v4639_v38  ;;  %3542 = vmatprep.subr.bf16.mxu1 %v3969_v40  ;;  %v4705_v45 = vsel %vm1578_vm3, %v1625_v43, %v1629_v23  ;;  %v1633_v33 = vor.u32 %v1631_v3, %v1629_v23  ;;  %v3979_v40 = vld [vmem:[%s5145_s3 + $0x1a0] sm:$0xff]   ;;  %v3988_v23 = vld [vmem:[%s5145_s3 + $0x188] sm:$0xff]  }
 0x12f   : > { %3801 = vmatpush3.bf16.msra.mxu0 %v3957_v36 }
 0x130   : > { %v4656_v57 = vld [vmem:[#allocation2 + $0x48] sm:$0xff]   ;;  %1995 = vmatmul.mubr.bf16.gmra.mxu1 %v4484_v5  ;;  %3802 = vmatprep.subr.bf16.mxu0 %v3960_v51  ;;  %v4735_v12 = vsel %vm1578_vm3, %v1633_v33, %v1637_v55 }
 0x131   : > { %v4658_v60 = vld [vmem:[#allocation2 + $0x40] sm:$0xff]   ;;  %v1691_v8 = vrot.slane %v4656_v57, 1  ;;  %2002 = vmatprep.mubr.bf16.mxu1 %v4662_v15  ;;  %3543 = vmatpush3.bf16.msra.mxu1 %v3971_v24  ;;  %v1651_v24 = vshll.u32 %v4656_v57, 16 }
 0x132   : > { %v1689_v13 = vrot.slane %v4658_v60, 1  ;;  %3544 = vmatprep.subr.bf16.mxu1 %v3975_v62  ;;  %v1643_v36 = vshll.u32 %v4658_v60, 16  ;;  %v1647_v62 = vshrl.u32 %v4658_v60, 16 }
 0x133   : > { %3803 = vmatpush3.bf16.msra.mxu0 %v3960_v51  ;;  %v4686_v52 = vsel %vm1673_vm2, %v1691_v8, %v1693_v25  ;;  %v3980_v51 = vld [vmem:[%s5145_s3 + $0x1d8] sm:$0xff]  }
 0x134   : > { %v4680_v26 = vsel %vm1673_vm2, %v1687_v46, %v1689_v13  ;;  %v4683_v22 = vsel %vm1673_vm2, %v1689_v13, %v1691_v8  ;;  %3804 = vmatprep.subr.bf16.mxu0 %v3963_v63  ;;  %v1639_v46 = vshrl.u32 %v4607_v35, 16  ;;  %v1645_v20 = vrot.slane %v1643_v36, 1 }
 0x135   : > { %3788 = vmatprep.mubr.bf16.mxu0 %v4680_v26  ;;  %3545 = vmatpush3.bf16.msra.mxu1 %v3977_v17  ;;  %v1582_v13 = vshll.u32 %v4648_v42, 16  ;;  %v3985_v17 = vld [vmem:[%s5145_s3 + $0x190] sm:$0xff]  }
 0x136   : > { %3789 = vmatmul.mubr.bf16.gmra.mxu0 %v4683_v22  ;;  %3546 = vmatprep.subr.bf16.mxu1 %v3981_v1  ;;  %v1641_v39 = vor.u32 %v1639_v46, %v1637_v55  ;;  %v1649_v8 = vor.u32 %v1647_v62, %v1645_v20  ;;  %v1580_v1 = vshrl.u32 %v4648_v42, 16 }
 0x137   : > { %3805 = vmatpush3.bf16.msra.mxu0 %v3963_v63  ;;  %3808 = vmatprep.mubr.bf16.mxu0 %v1676_v59  ;;  %v4767_v63 = vrot.slane %v1651_v24, 1  ;;  %v1584_v21 = vrot.slane %v1582_v13, 1  ;;  %v3991_v59 = vld [vmem:[%s5145_s3 + $0x180] sm:$0xff]  }
 0x138   : > { %2003 = vmatmul.mubr.bf16.gmra.mxu1 %v4561_v58  ;;  %3806 = vmatprep.subr.bf16.mxu0 %v3967_v50  ;;  %v4756_v47 = vsel %vm1578_vm3, %v1641_v39, %v1645_v20 }
 0x139   : > { %2010 = vmatprep.mubr.bf16.mxu1 %v4705_v45  ;;  %3547 = vmatpush3.bf16.msra.mxu1 %v3983_v31  ;;  %v4781_v25 = vsel %vm1578_vm3, %v1649_v8, %v4767_v63  ;;  %v3990_v31 = vld [vmem:[%s5145_s3 + $0x1c0] sm:$0xff]  }
 0x13a   : > { %3548 = vmatprep.subr.bf16.mxu1 %v3987_v10  ;;  %v3993_v10 = vld [vmem:[%s5145_s3 + $0x230] sm:$0xff]  }
 0x13b   : > { %3807 = vmatpush3.bf16.msra.mxu0 %v3967_v50  ;;  %v1585_v50 = vor.u32 %v1584_v21, %v1580_v1 }
 0x13c   : > { %3614 = vmatprep.subr.bf16.mxu0 %v3968_v2  ;;  %v3995_v2 = vld [vmem:[%s5145_s3 + $0x220] sm:$0xff]  }
 0x13d   : > { %3549 = vmatpush3.bf16.msra.mxu1 %v3989_v4  ;;  %v1590_v43 = vsel %vm1578_vm3, %v1585_v50, %v4476_v7  ;;  %v3994_v7 = vld [vmem:[%s5145_s3 + $0x228] sm:$0xff]  }
 0x13e   : > { %3809 = vmatmul.mubr.bf16.vlgmr.msra.gmra.mxu0 %v4508_v44  ;;  %3824 = vmatprep.subr.bf16.mxu1 %v4719_v18  ;;  %v3974_v44 = vld [vmem:[%s5145_s3 + $0x1e8] sm:$0xff]  }
 0x13f   : > { %3812 = vmatprep.mubr.bf16.mxu0 %v4513_v48  ;;  %3615 = vmatpush3.bf16.msra.mxu0 %v3970_v32 }
 0x140   : > { %2011 = vmatmul.mubr.bf16.gmra.mxu1 %v4531_v49  ;;  %3616 = vmatprep.subr.bf16.mxu0 %v3972_v53 }
 0x141   : > { %2018 = vmatprep.mubr.bf16.mxu1 %v4735_v12 }
 0x143   : > { %3617 = vmatpush3.bf16.msra.mxu0 %v3973_v56 }
 0x144   : > { %3618 = vmatprep.subr.bf16.mxu0 %v3974_v44 }
 0x146   : > { %3813 = vmatmul.mubr.bf16.gmra.mxu0 %v4593_v6 }
 0x147   : > { %3816 = vmatprep.mubr.bf16.mxu0 %v4596_v29  ;;  %3619 = vmatpush3.bf16.msra.mxu0 %v3976_v37 }
 0x148   : > { %2019 = vmatmul.mubr.bf16.gmra.mxu1 %v4615_v16  ;;  %3620 = vmatprep.subr.bf16.mxu0 %v3978_v41 }
 0x149   : > { %2026 = vmatprep.mubr.bf16.mxu1 %v4756_v47 }
 0x14b   : > { %3621 = vmatpush3.bf16.msra.mxu0 %v3979_v40 }
 0x14c   : > { %3622 = vmatprep.subr.bf16.mxu0 %v3980_v51 }
 0x14e   : > { %3817 = vmatmul.mubr.bf16.gmra.mxu0 %v4636_v19 }
 0x14f   : > { %3820 = vmatprep.mubr.bf16.mxu0 %v4639_v38  ;;  %3623 = vmatpush3.bf16.msra.mxu0 %v3982_v54 }
 0x150   : > { %2027 = vmatmul.mubr.bf16.gmra.mxu1 %v4607_v35  ;;  %3624 = vmatprep.subr.bf16.mxu0 %v3984_v11 }
 0x151   : > { %2034 = vmatprep.mubr.bf16.mxu1 %v4781_v25 }
 0x153   : > { %3625 = vmatpush3.bf16.msra.mxu0 %v3985_v17 }
 0x154   : > { %3626 = vmatprep.subr.bf16.mxu0 %v3986_v0 }
 0x156   : > { %3821 = vmatmul.mubr.bf16.gmra.mxu0 %v4680_v26 }
 0x157   : > { %3627 = vmatpush3.bf16.msra.mxu0 %v3988_v23  ;;  %2703 = vmatprep.mubr.bf16.mxu0 %v4559_v61 }
 0x158   : > { %2035 = vmatmul.mubr.bf16.gmra.mxu1 %v4658_v60  ;;  %3628 = vmatprep.subr.bf16.mxu0 %v3990_v31 }
 0x159   : > { %2316 = vmatprep.mubr.bf16.mxu1 %v1590_v43 }
 0x15b   : > { %3629 = vmatpush3.bf16.msra.mxu0 %v3991_v59 }
 0x15e   : > { %2704 = vmatmul.mubr.bf16.vlgmr.msra.gmra.mxu0 %v4492_v27 }
 0x15f   : > { %2711 = vmatprep.mubr.bf16.mxu0 %v4619_v34 }
 0x160   : > { %2317 = vmatmul.mubr.bf16.vlgmr.msra.gmra.mxu1 %v4648_v42  ;;  %v3997_v42 = vld [vmem:[%s5145_s3 + $0x210] sm:$0xff]  }
 0x161   : > { %3825 = vmatpush3.bf16.msra.mxu1 %v4719_v18  ;;  %2324 = vmatprep.mubr.bf16.mxu1 %v4529_v9  ;;  %v3996_v9 = vld [vmem:[%s5145_s3 + $0x218] sm:$0xff]  }
 0x162   : > { %3826 = vmatprep.subr.bf16.mxu1 %v3993_v10 }
 0x165   : > { %3827 = vmatpush3.bf16.msra.mxu1 %v3993_v10 }
 0x166   : > { %2712 = vmatmul.mubr.bf16.gmra.mxu0 %v4484_v5  ;;  %3828 = vmatprep.subr.bf16.mxu1 %v3994_v7 }
 0x167   : > { %2719 = vmatprep.mubr.bf16.mxu0 %v4662_v15 }
 0x168   : > { %2325 = vmatmul.mubr.bf16.gmra.mxu1 %v4433_v30  ;;  %v3998_v30 = vld [vmem:[%s5145_s3 + $0x208] sm:$0xff]  }
 0x169   : > { %2332 = vmatprep.mubr.bf16.mxu1 %v4559_v61  ;;  %3829 = vmatpush3.bf16.msra.mxu1 %v3994_v7  ;;  %v3999_v61 = vld [vmem:[%s5145_s3 + $0x200] sm:$0xff]  }
 0x16a   : > { %3830 = vmatprep.subr.bf16.mxu1 %v3995_v2 }
 0x16d   : > { %3831 = vmatpush3.bf16.msra.mxu1 %v3995_v2 }
 0x16e   : > { %2720 = vmatmul.mubr.bf16.gmra.mxu0 %v4561_v58  ;;  %3832 = vmatprep.subr.bf16.mxu1 %v3996_v9 }
 0x16f   : > { %2727 = vmatprep.mubr.bf16.mxu0 %v4705_v45 }
 0x170   : > { %2333 = vmatmul.mubr.bf16.gmra.mxu1 %v4492_v27  ;;  %v1655_v27 = vshrl.u32 %v4656_v57, 16 }
 0x171   : > { %2340 = vmatprep.mubr.bf16.mxu1 %v4619_v34  ;;  %3833 = vmatpush3.bf16.msra.mxu1 %v3996_v9  ;;  %v1659_v34 = vshll.u32 %v4653_v14, 16 }
 0x172   : > { %3834 = vmatprep.subr.bf16.mxu1 %v3997_v42 }
 0x175   : > { %3835 = vmatpush3.bf16.msra.mxu1 %v3997_v42 }
 0x176   : > { %2728 = vmatmul.mubr.bf16.gmra.mxu0 %v4531_v49  ;;  %3836 = vmatprep.subr.bf16.mxu1 %v3998_v30 }
 0x177   : > { %2735 = vmatprep.mubr.bf16.mxu0 %v4735_v12 }
 0x178   : > { %2341 = vmatmul.mubr.bf16.gmra.mxu1 %v4484_v5  ;;  %v1657_v5 = vor.u32 %v1655_v27, %v4767_v63 }
 0x179   : > { %2348 = vmatprep.mubr.bf16.mxu1 %v4662_v15  ;;  %3837 = vmatpush3.bf16.msra.mxu1 %v3998_v30  ;;  %v1661_v15 = vrot.slane %v1659_v34, 1 }
 0x17a   : > { %3838 = vmatprep.subr.bf16.mxu1 %v3999_v61 }
 0x17b   : > { %v1662_v4 = vsel %vm1578_vm3, %v1657_v5, %v1661_v15 }
 0x17d   : > { %3839 = vmatpush3.bf16.msra.mxu1 %v3999_v61 }
 0x17e   : > { %2736 = vmatmul.mubr.bf16.gmra.mxu0 %v4615_v16 }
 0x17f   : > { %2743 = vmatprep.mubr.bf16.mxu0 %v4756_v47 }
 0x180   : > { %2349 = vmatmul.mubr.bf16.gmra.mxu1 %v4561_v58 }
 0x181   : > { %2356 = vmatprep.mubr.bf16.mxu1 %v4705_v45 }
 0x186   : > { %2744 = vmatmul.mubr.bf16.gmra.mxu0 %v4607_v35 }
 0x187   : > { %2751 = vmatprep.mubr.bf16.mxu0 %v4781_v25 }
 0x188   : > { %2357 = vmatmul.mubr.bf16.gmra.mxu1 %v4531_v49 }
 0x189   : > { %2364 = vmatprep.mubr.bf16.mxu1 %v4735_v12 }
 0x18e   : > { %2752 = vmatmul.mubr.bf16.gmra.mxu0 %v4658_v60 }
 0x18f   : > { %2759 = vmatprep.mubr.bf16.mxu0 %v1662_v4 }
 0x190   : > { %2365 = vmatmul.mubr.bf16.gmra.mxu1 %v4615_v16 }
 0x191   : > { %2372 = vmatprep.mubr.bf16.mxu1 %v4756_v47 }
 0x196   : > { %2760 = vmatmul.mubr.bf16.gmra.mxu0 %v4656_v57 }
 0x198   : > { %2373 = vmatmul.mubr.bf16.gmra.mxu1 %v4607_v35 }
 0x199   : > { %3840 = vmatprep.mubr.bf16.mxu1 %v4513_v48 }
 0x1a0   : > { %3841 = vmatmul.mubr.bf16.vlgmr.msra.gmra.mxu1 %v4593_v6 }
 0x1a1   : > { %3844 = vmatprep.mubr.bf16.mxu1 %v4596_v29 }
 0x1a8   : > { %3845 = vmatmul.mubr.bf16.gmra.mxu1 %v4636_v19 }
 0x1a9   : > { %3848 = vmatprep.mubr.bf16.mxu1 %v4639_v38 }
 0x1b0   : > { %3849 = vmatmul.mubr.bf16.gmra.mxu1 %v4680_v26 }
 0x1b1   : > { %3852 = vmatprep.mubr.bf16.mxu1 %v4683_v22 }
 0x1b8   : > { %3853 = vmatmul.mubr.bf16.gmra.mxu1 %v4686_v52 }
 0x1de   : > { %v3778_v49 = vpop.f32.mrf.mxu0 }
 0x1e0   : > { %v3470_v58 = vpop.f32.mrf.mxu1  ;;  %v2077_v16 = vpop.f32.mrf.mxu0 }
 0x1e2   : > { %v3471_v35 = vpop.f32.mrf.mxu1  ;;  %v3779_v14 = vpop.f32.mrf.mxu0 }
 0x1e3   : > { %v3472_v48 = vadd.f32 %v3471_v35, %v3470_v58 }
 0x1e4   : > { %v3473_v57 = vpop.f32.mrf.mxu1  ;;  %v2080_v6 = vpop.f32.mrf.mxu0 }
 0x1e5   : > { %v4865_v60 = vadd.f32 %v3472_v48, %v2077_v16 }
 0x1e6   : > { %v3474_v29 = vpop.f32.mrf.mxu1  ;;  %v3782_v19 = vpop.f32.mrf.mxu0 }
 0x1e7   : > { %v3475_v45 = vadd.f32 %v3474_v29, %v3473_v57 }
 0x1e8   : > { %v3476_v38 = vpop.f32.mrf.mxu1  ;;  %v2093_v3 = vpop.f32.mrf.mxu0 }
 0x1e9   : > { %v4867_v26 = vadd.f32 %v3475_v45, %v2080_v6 }
 0x1ea   : > { %v3477_v22 = vpop.f32.mrf.mxu1  ;;  %v3783_v28 = vpop.f32.mrf.mxu0 }
 0x1eb   : > { %v3478_v52 = vadd.f32 %v3477_v22, %v3476_v38 }
 0x1ec   : > { %v3479_v18 = vpop.f32.mrf.mxu1  ;;  %v2096_v32 = vpop.f32.mrf.mxu0 }
 0x1ed   : > { %v4869_v33 = vadd.f32 %v3778_v49, %v3478_v52 }
 0x1ee   : > { %v3480_v53 = vpop.f32.mrf.mxu1  ;;  %v3786_v55 = vpop.f32.mrf.mxu0 }
 0x1ef   : > { %v3481_v56 = vadd.f32 %v3480_v53, %v3479_v18 }
 0x1f0   : > { %v3482_v12 = vpop.f32.mrf.mxu1  ;;  %v2109_v44 = vpop.f32.mrf.mxu0 }
 0x1f1   : > { %v4871_v36 = vadd.f32 %v3779_v14, %v3481_v56 }
 0x1f2   : > { %v3483_v37 = vpop.f32.mrf.mxu1  ;;  %v3787_v46 = vpop.f32.mrf.mxu0 }
 0x1f3   : > { %v3484_v20 = vadd.f32 %v3483_v37, %v3482_v12 }
 0x1f4   : > { %v3485_v41 = vpop.f32.mrf.mxu1  ;;  %v2112_v39 = vpop.f32.mrf.mxu0 }
 0x1f5   : > { %v4873_v40 = vadd.f32 %v3484_v20, %v2093_v3 }
 0x1f6   : > { %v3486_v47 = vpop.f32.mrf.mxu1  ;;  %v3790_v51 = vpop.f32.mrf.mxu0 }
 0x1f7   : > { %v3487_v24 = vadd.f32 %v3486_v47, %v3485_v41 }
 0x1f8   : > { %v3488_v62 = vpop.f32.mrf.mxu1  ;;  %v2125_v54 = vpop.f32.mrf.mxu0 }
 0x1f9   : > { %v4875_v8 = vadd.f32 %v3487_v24, %v2096_v32 }
 0x1fa   : > { %v3489_v63 = vpop.f32.mrf.mxu1  ;;  %v3791_v11 = vpop.f32.mrf.mxu0 }
 0x1fb   : > { %v3490_v13 = vadd.f32 %v3489_v63, %v3488_v62 }
 0x1fc   : > { %v3491_v17 = vpop.f32.mrf.mxu1  ;;  %v2128_v25 = vpop.f32.mrf.mxu0 }
 0x1fd   : > { %v4877_v0 = vadd.f32 %v3782_v19, %v3490_v13 }
 0x1fe   : > { %v3492_v1 = vpop.f32.mrf.mxu1  ;;  %v4879_v21 = vpop.f32.mrf.mxu0 }
 0x1ff   : > { %v3493_v23 = vadd.f32 %v3492_v1, %v3491_v17 }
 0x200   : > { %v3494_v50 = vpop.f32.mrf.mxu1  ;;  %v2415_v31 = vpop.f32.mrf.mxu0 }
 0x201   : > { %v4881_v59 = vadd.f32 %v3783_v28, %v3493_v23 }
 0x202   : > { %v3495_v43 = vpop.f32.mrf.mxu1  ;;  %v4883_v10 = vpop.f32.mrf.mxu0 }
 0x203   : > { %v3496_v7 = vadd.f32 %v3495_v43, %v3494_v50 }
 0x204   : > { %v3497_v2 = vpop.f32.mrf.mxu1  ;;  %v2418_v9 = vpop.f32.mrf.mxu0 }
 0x205   : > { %v4885_v42 = vadd.f32 %v3496_v7, %v2109_v44 }
 0x206   : > { %v3498_v30 = vpop.f32.mrf.mxu1  ;;  %v4887_v61 = vpop.f32.mrf.mxu0 }
 0x207   : > { %v3499_v27 = vadd.f32 %v3498_v30, %v3497_v2 }
 0x208   : > { %v3500_v34 = vpop.f32.mrf.mxu1  ;;  %v4889_v5 = vpop.f32.mrf.mxu0 }
 0x209   : > { %v4891_v15 = vadd.f32 %v3499_v27, %v2112_v39 }
 0x20a   : > { %v3501_v4 = vpop.f32.mrf.mxu1  ;;  %v4893_v49 = vpop.f32.mrf.mxu0 }
 0x20b   : > { %v3502_v58 = vadd.f32 %v3501_v4, %v3500_v34 }
 0x20c   : > { %v3503_v16 = vpop.f32.mrf.mxu1  ;;  %v4895_v35 = vpop.f32.mrf.mxu0 }
 0x20d   : > { %v4897_v14 = vadd.f32 %v3786_v55, %v3502_v58 }
 0x20e   : > { %v3504_v48 = vpop.f32.mrf.mxu1  ;;  %v4899_v57 = vpop.f32.mrf.mxu0 }
 0x20f   : > { %v3505_v6 = vadd.f32 %v3504_v48, %v3503_v16 }
 0x210   : > { %v3506_v29 = vpop.f32.mrf.mxu1  ;;  %v4901_v19 = vpop.f32.mrf.mxu0 }
 0x211   : > { %v4903_v45 = vadd.f32 %v3787_v46, %v3505_v6 }
 0x212   : > { %v3507_v38 = vpop.f32.mrf.mxu1  ;;  %v4905_v3 = vpop.f32.mrf.mxu0 }
 0x213   : > { %v3508_v22 = vadd.f32 %v3507_v38, %v3506_v29 }
 0x214   : > { %v3509_v28 = vpop.f32.mrf.mxu1  ;;  %v4907_v52 = vpop.f32.mrf.mxu0 }
 0x215   : > { %v4909_v18 = vadd.f32 %v3508_v22, %v2125_v54 }
 0x216   : > { %v3510_v32 = vpop.f32.mrf.mxu1  ;;  %v4911_v53 = vpop.f32.mrf.mxu0 }
 0x217   : > { %v3511_v55 = vadd.f32 %v3510_v32, %v3509_v28 }
 0x218   : > { %v3512_v56 = vpop.f32.mrf.mxu1  ;;  %v4913_v12 = vpop.f32.mrf.mxu0 }
 0x219   : > { %v4915_v44 = vadd.f32 %v3511_v55, %v2128_v25 }
 0x21a   : > { %v3513_v37 = vpop.f32.mrf.mxu1  ;;  %v4917_v46 = vpop.f32.mrf.mxu0 }
 0x21b   : > { %v3514_v20 = vadd.f32 %v3513_v37, %v3512_v56 }
 0x21c   : > { %v3515_v41 = vpop.f32.mrf.mxu1  ;;  %v4919_v39 = vpop.f32.mrf.mxu0 }
 0x21d   : > { %v4921_v47 = vadd.f32 %v3790_v51, %v3514_v20 }
 0x21e   : > { %v3516_v24 = vpop.f32.mrf.mxu1  ;;  %v4923_v62 = vpop.f32.mrf.mxu0 }
 0x21f   : > { %v3517_v54 = vadd.f32 %v3516_v24, %v3515_v41 }
 0x220   : > { %v3550_v63 = vpop.f32.mrf.mxu1  ;;  %v4925_v13 = vpop.f32.mrf.mxu0 }
 0x221   : > { %v4927_v17 = vadd.f32 %v3791_v11, %v3517_v54 }
 0x222   : > { %v3551_v25 = vpop.f32.mrf.mxu1  ;;  %v4929_v1 = vpop.f32.mrf.mxu0 }
 0x223   : > { %v3552_v23 = vadd.f32 %v3551_v25, %v3550_v63 }
 0x224   : > { %v3553_v50 = vpop.f32.mrf.mxu1  ;;  %v4931_v43 = vpop.f32.mrf.mxu0 }
 0x225   : > { %v2319_v7 = vadd.f32 %v3552_v23, %v4865_v60 }
 0x226   : > { %v3554_v51 = vpop.f32.mrf.mxu1  ;;  %v4934_v2 = vpop.f32.mrf.mxu0 }
 0x227   : > { %v3555_v30 = vadd.f32 %v3554_v51, %v3553_v50  ;;  %v4936_v27 = vadd.f32 %v2415_v31, %v2319_v7 }
 0x228   : > { %v3556_v34 = vpop.f32.mrf.mxu1  ;;  %v4938_v4 = vpop.f32.mrf.mxu0 }
 0x229   : > { %v2322_v11 = vadd.f32 %v3555_v30, %v4867_v26 }
 0x22a   : > { %v3557_v58 = vpop.f32.mrf.mxu1  ;;  %v4941_v16 = vpop.f32.mrf.mxu0 }
 0x22b   : > { %v3558_v48 = vadd.f32 %v3557_v58, %v3556_v34  ;;  %v4943_v6 = vadd.f32 %v2418_v9, %v2322_v11 }
 0x22c   : > { %v3559_v29 = vpop.f32.mrf.mxu1  ;;  %v4945_v38 = vpop.f32.mrf.mxu0 }
 0x22d   : > { %v2327_v60 = vadd.f32 %v3558_v48, %v4869_v33 }
 0x22e   : > { %v3560_v22 = vpop.f32.mrf.mxu1  ;;  %v4948_v28 = vpop.f32.mrf.mxu0 }
 0x22f   : > { %v3561_v31 = vadd.f32 %v3560_v22, %v3559_v29  ;;  %v4951_v32 = vadd.f32 %v4879_v21, %v2327_v60 }
 0x230   : > { %v3562_v55 = vpop.f32.mrf.mxu1  ;;  %v4953_v26 = vpop.f32.mrf.mxu0 }
 0x231   : > { %v2330_v56 = vadd.f32 %v3561_v31, %v4871_v36 }
 0x232   : > { %v3563_v37 = vpop.f32.mrf.mxu1  ;;  %v4956_v9 = vpop.f32.mrf.mxu0 }
 0x233   : > { %v3564_v20 = vadd.f32 %v3563_v37, %v3562_v55  ;;  %v4959_v41 = vadd.f32 %v4883_v10, %v2330_v56 }
 0x234   : > { %v3565_v33 = vpop.f32.mrf.mxu1  ;;  %v4961_v24 = vpop.f32.mrf.mxu0 }
 0x235   : > { %v2335_v54 = vadd.f32 %v3564_v20, %v4873_v40 }
 0x236   : > { %v3566_v63 = vpop.f32.mrf.mxu1  ;;  %v4964_v21 = vpop.f32.mrf.mxu0 }
 0x237   : > { %v3567_v25 = vadd.f32 %v3566_v63, %v3565_v33  ;;  %v4967_v23 = vadd.f32 %v4889_v5, %v2335_v54 }
 0x238   : > { %v3568_v36 = vpop.f32.mrf.mxu1  ;;  %v4969_v50 = vpop.f32.mrf.mxu0 }
 0x239   : > { %v2338_v7 = vadd.f32 %v3567_v25, %v4875_v8 }
 0x23a   : > { %v3569_v51 = vpop.f32.mrf.mxu1  ;;  %v4972_v10 = vpop.f32.mrf.mxu0 }
 0x23b   : > { %v3570_v30 = vadd.f32 %v3569_v51, %v3568_v36  ;;  %v4975_v34 = vadd.f32 %v4895_v35, %v2338_v7 }
 0x23c   : > { %v3571_v40 = vpop.f32.mrf.mxu1  ;;  %v4977_v11 = vpop.f32.mrf.mxu0 }
 0x23d   : > { %v2343_v58 = vadd.f32 %v3570_v30, %v4877_v0 }
 0x23e   : > { %v3572_v48 = vpop.f32.mrf.mxu1  ;;  %v4980_v5 = vpop.f32.mrf.mxu0 }
 0x23f   : > { %v3573_v29 = vadd.f32 %v3572_v48, %v3571_v40  ;;  %v4983_v60 = vadd.f32 %v4887_v61, %v2343_v58 }
 0x240   : > { %v3574_v8 = vpop.f32.mrf.mxu1  ;;  %v4986_v31 = vpop.f32.mrf.mxu0 }
 0x241   : > { %v2346_v22 = vadd.f32 %v3573_v29, %v4881_v59 }
 0x242   : > { %v3575_v55 = vpop.f32.mrf.mxu1  ;;  %v4992_v20 = vpop.f32.mrf.mxu0 }
 0x243   : > { %v3576_v35 = vadd.f32 %v3575_v55, %v3574_v8  ;;  %v4989_v56 = vadd.f32 %v4893_v49, %v2346_v22 }
 0x244   : > { %v3577_v37 = vpop.f32.mrf.mxu1  ;;  %v4997_v25 = vpop.f32.mrf.mxu0 }
 0x245   : > { %v2351_v0 = vadd.f32 %v3576_v35, %v4885_v42 }
 0x246   : > { %v3578_v33 = vpop.f32.mrf.mxu1  ;;  %v5003_v30 = vpop.f32.mrf.mxu0 }
 0x247   : > { %v3579_v54 = vadd.f32 %v3578_v33, %v3577_v37  ;;  %v4995_v61 = vadd.f32 %v4901_v19, %v2351_v0 }
 0x248   : > { %v3580_v63 = vpop.f32.mrf.mxu1  ;;  %v5009_v29 = vpop.f32.mrf.mxu0 }
 0x249   : > { %v2354_v59 = vadd.f32 %v3579_v54, %v4891_v15 }
 0x24a   : > { %v3581_v36 = vpop.f32.mrf.mxu1  ;;  %v5015_v35 = vpop.f32.mrf.mxu0 }
 0x24b   : > { %v3582_v7 = vadd.f32 %v3581_v36, %v3580_v63  ;;  %v5001_v49 = vadd.f32 %v4907_v52, %v2354_v59 }
 0x24c   : > { %v3583_v51 = vpop.f32.mrf.mxu1  ;;  %v5023_v54 = vpop.f32.mrf.mxu0 }
 0x24d   : > { %v2359_v42 = vadd.f32 %v3582_v7, %v4897_v14 }
 0x24e   : > { %v3584_v40 = vpop.f32.mrf.mxu1  ;;  %v5031_v36 = vpop.f32.mrf.mxu0 }
 0x24f   : > { %v3585_v58 = vadd.f32 %v3584_v40, %v3583_v51  ;;  %v5007_v19 = vadd.f32 %v4899_v57, %v2359_v42  ;;  %v3632_v51 = vadd.f32 %v4925_v13, %v4923_v62  ;;  %v3635_v62 = vadd.f32 %v4931_v43, %v4929_v1 }
 0x250   : > { %v3586_v48 = vpop.f32.mrf.mxu1  ;;  %v5039_v42 = vpop.f32.mrf.mxu0 }
 0x251   : > { %v2362_v15 = vadd.f32 %v3585_v58, %v4903_v45  ;;  %v3641_v58 = vadd.f32 %v4945_v38, %v4941_v16 }
 0x252   : > { %v3587_v8 = vpop.f32.mrf.mxu1  ;;  %v5052_v13 = vpop.f32.mrf.mxu0 }
 0x253   : > { %v3588_v22 = vadd.f32 %v3587_v8, %v3586_v48  ;;  %v5013_v52 = vadd.f32 %v4905_v3, %v2362_v15 }
 0x254   : > { %v3589_v55 = vpop.f32.mrf.mxu1 }
 0x255   : > { %v2367_v14 = vadd.f32 %v3588_v22, %v4909_v18 }
 0x256   : > { %v3590_v37 = vpop.f32.mrf.mxu1 }
 0x257   : > { %v3591_v0 = vadd.f32 %v3590_v37, %v3589_v55  ;;  %v5019_v57 = vadd.f32 %v4913_v12, %v2367_v14  ;;  %v3638_v12 = vadd.f32 %v4938_v4, %v4934_v2  ;;  %v3650_v55 = vadd.f32 %v4969_v50, %v4964_v21  ;;  %v5067_v37 = vpop.f32.mrf.mxu0 }
 0x258   : > { %v5021_v33 = vpop.f32.mrf.mxu1 }
 0x259   : > { %v2370_v45 = vadd.f32 %v3591_v0, %v4915_v44 }
 0x25a   : > { %v3593_v63 = vpop.f32.mrf.mxu1 }
 0x25b   : > { %v5027_v3 = vadd.f32 %v4919_v39, %v2370_v45  ;;  %v5044_v39 = vld [vmem:[%s5146_s4] ss:$0 sm:$0xff] }
 0x25c   : > { %v5029_v59 = vpop.f32.mrf.mxu1 }
 0x25e   : > { %v5033_v18 = vpop.f32.mrf.mxu1 }
 0x260   : > { %v3842_v7 = vpop.f32.mrf.mxu1 }
 0x261   : > { %v2811_v44 = vadd.f32 %v3842_v7, %v3638_v12  ;;  %v3653_v12 = vadd.f32 %v4977_v11, %v4972_v10 }
 0x262   : > { %v2802_v40 = vpop.f32.mrf.mxu1 }
 0x263   : > { %v2867_v48 = vadd.f32 %v2811_v44, %v4951_v32  ;;  %v2803_v2 = vadd.f32 %v3632_v51, %v2802_v40  ;;  %v3672_v44 = vpop.f32.mrf.mxu0  ;;  %v3647_v40 = vadd.f32 %v4961_v24, %v4956_v9 }
 0x264   : > { %v3843_v4 = vpop.f32.mrf.mxu1 }
 0x265   : > { %v2890_v15 = vadd.f32 %v5044_v39, %v2867_v48  ;;  %v2865_v8 = vadd.f32 %v2803_v2, %v4936_v27  ;;  %v2814_v22 = vadd.f32 %v3843_v4, %v3641_v58  ;;  %v3644_v27 = vadd.f32 %v4953_v26, %v4948_v28 }
 0x266   : > { %v2805_v16 = vpop.f32.mrf.mxu1  ;;  %v3662_v2 = vadd.f32 %v5009_v29, %v5003_v30 }
 0x267   : > { %v2906_v38 = vmax.f32 %v2890_v15, 0.0  ;;  %v2888_v1 = vadd.f32 %v5044_v39, %v2865_v8  ;;  %v2868_v43 = vadd.f32 %v2814_v22, %v4959_v41  ;;  %v2806_v32 = vadd.f32 %v3635_v62, %v2805_v16  ;;  %v3673_v15 = vpop.f32.mrf.mxu0 }
 0x268   : > { %v3846_v14 = vpop.f32.mrf.mxu1  ;;  %v3656_v8 = vadd.f32 %v4986_v31, %v4980_v5  ;;  %v3594_v22 = vadd.f32 %v3593_v63, %v5021_v33 }
 0x269   : > { %2922 = vst [vmem:[%s5061_s18 + $0x10] sm:$0xff] %v2906_v38  ;;  %v2904_v21 = vmax.f32 %v2888_v1, 0.0  ;;  %v2891_v50 = vadd.f32 %v5044_v39, %v2868_v43  ;;  %v2866_v0 = vadd.f32 %v2806_v32, %v4943_v6  ;;  %v2827_v45 = vadd.f32 %v3846_v14, %v3650_v55  ;;  %v3675_v63 = vpop.f32.mrf.mxu0 }
 0x26a   : > { %v2818_v7 = vpop.f32.mrf.mxu1  ;;  %v3665_v38 = vadd.f32 %v5023_v54, %v5015_v35  ;;  %v3659_v43 = vadd.f32 %v4997_v25, %v4992_v20  ;;  %v2375_v32 = vadd.f32 %v3594_v22, %v4921_v47 }
 0x26b   : > { %2920 = vst [vmem:[%s5061_s18] sm:$0xff] %v2904_v21  ;;  %v2907_v41 = vmax.f32 %v2891_v50, 0.0  ;;  %v2889_v28 = vadd.f32 %v5044_v39, %v2866_v0  ;;  %v2871_v26 = vadd.f32 %v2827_v45, %v4983_v60  ;;  %v2819_v51 = vadd.f32 %v3644_v27, %v2818_v7  ;;  %v3676_v25 = vpop.f32.mrf.mxu0 }
 0x26c   : > { %v3847_v58 = vpop.f32.mrf.mxu1  ;;  %v3674_v27 = vadd.f32 %v3673_v15, %v3672_v44 }
 0x26d   : > { %2923 = vst [vmem:[%s5061_s18 + $0x18] sm:$0xff] %v2907_v41  ;;  %v2905_v6 = vmax.f32 %v2889_v28, 0.0  ;;  %v2894_v48 = vadd.f32 %v5044_v39, %v2871_v26  ;;  %v2869_v10 = vadd.f32 %v2819_v51, %v4967_v23  ;;  %v2830_v11 = vadd.f32 %v3847_v58, %v3653_v12 }
 0x26e   : > { %v2821_v4 = vpop.f32.mrf.mxu1  ;;  %v2472_v12 = vadd.f32 %v4911_v53, %v2375_v32  ;;  %v3677_v51 = vadd.f32 %v3676_v25, %v3675_v63  ;;  %v3671_v53 = vadd.f32 %v5067_v37, %v5052_v13 }
 0x26f   : > { %2921 = vst [vmem:[%s5061_s18 + $0x8] sm:$0xff] %v2905_v6  ;;  %v2910_v60 = vmax.f32 %v2894_v48, 0.0  ;;  %v2892_v62 = vadd.f32 %v5044_v39, %v2869_v10  ;;  %v2872_v9 = vadd.f32 %v2830_v11, %v4989_v56  ;;  %v2822_v24 = vadd.f32 %v3647_v40, %v2821_v4 }
 0x270   : > { %v3850_v23 = vpop.f32.mrf.mxu1 }
 0x271   : > { %2926 = vst [vmem:[%s5061_s18 + $0x30] sm:$0xff] %v2910_v60  ;;  %v2908_v55 = vmax.f32 %v2892_v62, 0.0  ;;  %v2895_v30 = vadd.f32 %v5044_v39, %v2872_v9  ;;  %v2870_v29 = vadd.f32 %v2822_v24, %v4975_v34  ;;  %v2843_v16 = vadd.f32 %v3850_v23, %v3662_v2 }
 0x272   : > { %v2834_v56 = vpop.f32.mrf.mxu1  ;;  %v3597_v34 = vadd.f32 %v5033_v18, %v5029_v59  ;;  %v3668_v18 = vadd.f32 %v5039_v42, %v5031_v36 }
 0x273   : > { %2924 = vst [vmem:[%s5061_s18 + $0x20] sm:$0xff] %v2908_v55  ;;  %v2911_v1 = vmax.f32 %v2895_v30, 0.0  ;;  %v2893_v5 = vadd.f32 %v5044_v39, %v2870_v29  ;;  %v2875_v31 = vadd.f32 %v2843_v16, %v5007_v19  ;;  %v2835_v33 = vadd.f32 %v3656_v8, %v2834_v56 }
 0x274   : > { %v3851_v35 = vpop.f32.mrf.mxu1  ;;  %v2378_v45 = vadd.f32 %v3597_v34, %v4927_v17 }
 0x275   : > { %2927 = vst [vmem:[%s5061_s18 + $0x38] sm:$0xff] %v2911_v1  ;;  %v2909_v54 = vmax.f32 %v2893_v5, 0.0  ;;  %v2898_v14 = vadd.f32 %v5044_v39, %v2875_v31  ;;  %v2873_v21 = vadd.f32 %v2835_v33, %v4995_v61  ;;  %v2846_v19 = vadd.f32 %v3851_v35, %v3665_v38 }
 0x276   : > { %v2837_v50 = vpop.f32.mrf.mxu1  ;;  %v2475_v40 = vadd.f32 %v4917_v46, %v2378_v45 }
 0x277   : > { %2925 = vst [vmem:[%s5061_s18 + $0x28] sm:$0xff] %v2909_v54  ;;  %v2914_v0 = vmax.f32 %v2898_v14, 0.0  ;;  %v2896_v20 = vadd.f32 %v5044_v39, %v2873_v21  ;;  %v2876_v47 = vadd.f32 %v2846_v19, %v5013_v52  ;;  %v2838_v59 = vadd.f32 %v3659_v43, %v2837_v50 }
 0x278   : > { %v3854_v7 = vpop.f32.mrf.mxu1 }
 0x279   : > { %2930 = vst [vmem:[%s5061_s18 + $0x50] sm:$0xff] %v2914_v0  ;;  %v2912_v61 = vmax.f32 %v2896_v20, 0.0  ;;  %v2899_v41 = vadd.f32 %v5044_v39, %v2876_v47  ;;  %v2874_v28 = vadd.f32 %v2838_v59, %v5001_v49  ;;  %v2859_v26 = vadd.f32 %v3854_v7, %v3674_v27 }
 0x27a   : > { %v2850_v52 = vpop.f32.mrf.mxu1 }
 0x27b   : > { %2928 = vst [vmem:[%s5061_s18 + $0x40] sm:$0xff] %v2912_v61  ;;  %v2915_v44 = vmax.f32 %v2899_v41, 0.0  ;;  %v2897_v36 = vadd.f32 %v5044_v39, %v2874_v28  ;;  %v2879_v42 = vadd.f32 %v2859_v26, %v2472_v12  ;;  %v2851_v17 = vadd.f32 %v3668_v18, %v2850_v52 }
 0x27c   : > { %v3855_v58 = vpop.f32.mrf.mxu1 }
 0x27d   : > { %2931 = vst [vmem:[%s5061_s18 + $0x58] sm:$0xff] %v2915_v44  ;;  %v2913_v49 = vmax.f32 %v2897_v36, 0.0  ;;  %v2902_v6 = vadd.f32 %v5044_v39, %v2879_v42  ;;  %v2877_v48 = vadd.f32 %v2851_v17, %v5019_v57  ;;  %v2862_v10 = vadd.f32 %v3855_v58, %v3677_v51 }
 0x27e   : > { %v2853_v11 = vpop.f32.mrf.mxu1 }
 0x27f   : > { %2929 = vst [vmem:[%s5061_s18 + $0x48] sm:$0xff] %v2913_v49  ;;  %v2918_v2 = vmax.f32 %v2902_v6, 0.0  ;;  %v2900_v4 = vadd.f32 %v5044_v39, %v2877_v48  ;;  %v2880_v60 = vadd.f32 %v2862_v10, %v2475_v40  ;;  %v2854_v13 = vadd.f32 %v3671_v53, %v2853_v11 }
 0x281   : > { %2934 = vst [vmem:[%s5061_s18 + $0x70] sm:$0xff] %v2918_v2  ;;  %v2916_v46 = vmax.f32 %v2900_v4, 0.0  ;;  %v2903_v37 = vadd.f32 %v5044_v39, %v2880_v60  ;;  %v2878_v62 = vadd.f32 %v2854_v13, %v5027_v3 }
 0x283   : > { %2932 = vst [vmem:[%s5061_s18 + $0x60] sm:$0xff] %v2916_v46  ;;  %v2919_v9 = vmax.f32 %v2903_v37, 0.0  ;;  %v2901_v24 = vadd.f32 %v5044_v39, %v2878_v62 }
 0x285   : > { %2935 = vst [vmem:[%s5061_s18 + $0x78] sm:$0xff] %v2919_v9  ;;  %v2917_v57 = vmax.f32 %v2901_v24, 0.0 }
 0x287   : > { %2933 = vst [vmem:[%s5061_s18 + $0x68] sm:$0xff] %v2917_v57 }
 0x288 PF: > { %s15_s20 = sadd.s32 1, %s4023_s20   ;;  %s5188_s18 = smov %s4019_s19 }
 0x289   : > { %p12_p5 = scmp.ge.s32.totalorder %s15_s20, 4   ;;  %s5189_s19 = smov %s5191_s21 }
 0x28b   :  { %14 = sbr.rel (!%p12_p5) target bundleno = 2 (0x2), region = 81 }

</bundles_post_ra>
